<compile_context>
chip_gen: v7x
topology: tpu7x:2x2x1
jax: 0.10.0
libtpu: 0.0.40
codegen_flags: <defaults>
</compile_context>

<pallas_src>
import functools

import jax
import jax.numpy as jnp
from jax import lax
from jax.experimental import pallas as pl
from jax.experimental.pallas import tpu as pltpu


# ----------------------------------------------------------------------------
# In-kernel helpers
# ----------------------------------------------------------------------------

def _dw_taps(src_ref, dw_ref, K, stride, Ho, Wo, C):
    """Accumulate K*K depthwise taps from a zero-padded VMEM ref.

    The stride is applied directly to the tap reads (strided pl.ds), so only
    the needed output pixels are ever computed.
    """
    acc = jnp.zeros((Ho, Wo, C), jnp.float32)
    for i in range(K):
        for j in range(K):
            if stride == 1:
                tap = src_ref[i:i + Ho, j:j + Wo, :]
            else:
                tap = src_ref[pl.ds(i, Ho, stride), pl.ds(j, Wo, stride), :]
            acc = acc + tap * dw_ref[i * K + j:i * K + j + 1, :]
    return acc


def _branch_main_compute(x_hwc, w1_ref, s1_ref, b1_ref, dw_ref, s2_ref, b2_ref,
                         w3_ref, s3_ref, b3_ref, mid_pad_ref,
                         *, K, stride, H, W, Ho, Wo, pad):
    """1x1+BN+ReLU -> depthwise KxK(stride)+BN -> 1x1+BN+ReLU, VMEM resident."""
    Cin = x_hwc.shape[-1]
    mid = dw_ref.shape[-1]
    Cout = w3_ref.shape[-1]

    # Stage 1: 1x1 conv (MXU matmul) + BN + ReLU, stored into the interior of a
    # zero-padded VMEM scratch (in-kernel halo; intermediate never hits HBM).
    mid_pad_ref[...] = jnp.zeros_like(mid_pad_ref)
    h1 = jnp.dot(x_hwc.reshape(H * W, Cin), w1_ref[...],
                 preferred_element_type=jnp.float32)
    h1 = jnp.maximum(h1 * s1_ref[...] + b1_ref[...], 0.0)
    mid_pad_ref[pad:pad + H, pad:pad + W, :] = h1.reshape(H, W, mid)

    # Stage 2: depthwise KxK (stride applied at the taps) + BN (no ReLU).
    acc = _dw_taps(mid_pad_ref, dw_ref, K, stride, Ho, Wo, mid)
    acc = acc * s2_ref[...] + b2_ref[...]

    # Stage 3: 1x1 conv (MXU matmul) + BN + ReLU.
    h3 = jnp.dot(acc.reshape(Ho * Wo, mid), w3_ref[...],
                 preferred_element_type=jnp.float32)
    h3 = jnp.maximum(h3 * s3_ref[...] + b3_ref[...], 0.0)
    return h3.reshape(Ho, Wo, Cout)


# ----------------------------------------------------------------------------
# Fused block kernels (one per stride case)
# ----------------------------------------------------------------------------

def _block_s1_kernel(K, H, W, pad,
                     x_ref, w1_ref, s1_ref, b1_ref, dw_ref, s2_ref, b2_ref,
                     w3_ref, s3_ref, b3_ref, o_ref, mid_pad_ref):
    """stride=1 block: proj passthrough + branch_main + channel concat, fused.

    x_ref: (2, 1, H, W, inp) -- [0]=even input channels (proj), [1]=odd (main)
    o_ref: (1, H, W, oup)
    """
    main = _branch_main_compute(
        x_ref[1, 0], w1_ref, s1_ref, b1_ref, dw_ref, s2_ref, b2_ref,
        w3_ref, s3_ref, b3_ref, mid_pad_ref,
        K=K, stride=1, H=H, W=W, Ho=H, Wo=W, pad=pad)
    proj = x_ref[0, 0].astype(jnp.float32)
    o_ref[0] = jnp.concatenate([proj, main], axis=-1)


def _block_s2_kernel(K, H, W, Ho, Wo, pad,
                     x_ref,
                     dwp_ref, sp1_ref, bp1_ref, wp_ref, sp2_ref, bp2_ref,
                     w1_ref, s1_ref, b1_ref, dw_ref, s2_ref, b2_ref,
                     w3_ref, s3_ref, b3_ref,
                     o_ref, x_pad_ref, mid_pad_ref):
    """stride=2 block: branch_proj + branch_main from ONE input read + concat.

    x_ref: (1, H, W, inp)   o_ref: (1, Ho, Wo, oup)
    """
    Cin = x_ref.shape[-1]
    x = x_ref[0].astype(jnp.float32)

    # branch_proj: depthwise KxK stride-2 + BN -> 1x1 + BN + ReLU.
    x_pad_ref[...] = jnp.zeros_like(x_pad_ref)
    x_pad_ref[pad:pad + H, pad:pad + W, :] = x
    accp = _dw_taps(x_pad_ref, dwp_ref, K, 2, Ho, Wo, Cin)
    accp = accp * sp1_ref[...] + bp1_ref[...]
    hp = jnp.dot(accp.reshape(Ho * Wo, Cin), wp_ref[...],
                 preferred_element_type=jnp.float32)
    hp = jnp.maximum(hp * sp2_ref[...] + bp2_ref[...], 0.0)
    proj = hp.reshape(Ho, Wo, wp_ref.shape[-1])

    # branch_main reuses the same VMEM-resident input tile (no 2nd HBM read).
    main = _branch_main_compute(
        x, w1_ref, s1_ref, b1_ref, dw_ref, s2_ref, b2_ref,
        w3_ref, s3_ref, b3_ref, mid_pad_ref,
        K=K, stride=2, H=H, W=W, Ho=Ho, Wo=Wo, pad=pad)

    o_ref[0] = jnp.concatenate([proj, main], axis=-1)


# ----------------------------------------------------------------------------
# pallas_call wrappers
# ----------------------------------------------------------------------------

def _out_hw(H, W, K, stride):
    pad = K // 2
    Ho = (H + 2 * pad - K) // stride + 1
    Wo = (W + 2 * pad - K) // stride + 1
    return Ho, Wo


def _vec(v):
    return v.reshape(1, -1)


def _fused_block_s1(x_shuf, params, *, inp, oup, mid, ksize):
    """x_shuf: (2, B, H, W, inp) -> (B, H, W, oup) NHWC (concat[proj, main])."""
    two, B, H, W, _ = x_shuf.shape
    assert two == 2
    K = ksize
    pad = K // 2
    outputs = oup - inp
    Hp, Wp = H + 2 * pad, W + 2 * pad
    s1, b1 = params["bn1"]
    s2, b2 = params["bn2"]
    s3, b3 = params["bn3"]

    kernel = functools.partial(_block_s1_kernel, K, H, W, pad)

    flops = B * (2 * H * W * inp * mid
                 + 2 * K * K * H * W * mid
                 + 2 * H * W * mid * outputs)
    bytes_accessed = 4 * (x_shuf.size + B * H * W * oup
                          + inp * mid + K * K * mid + mid * outputs
                          + 4 * mid + 2 * outputs)

    cspec = lambda C: pl.BlockSpec((1, C), lambda b: (0, 0))
    return pl.pallas_call(
        kernel,
        out_shape=jax.ShapeDtypeStruct((B, H, W, oup), jnp.float32),
        grid=(B,),
        in_specs=[
            pl.BlockSpec((2, 1, H, W, inp), lambda b: (0, b, 0, 0, 0)),
            pl.BlockSpec((inp, mid), lambda b: (0, 0)),
            cspec(mid), cspec(mid),
            pl.BlockSpec((K * K, mid), lambda b: (0, 0)),
            cspec(mid), cspec(mid),
            pl.BlockSpec((mid, outputs), lambda b: (0, 0)),
            cspec(outputs), cspec(outputs),
        ],
        out_specs=pl.BlockSpec((1, H, W, oup), lambda b: (b, 0, 0, 0)),
        scratch_shapes=[pltpu.VMEM((Hp, Wp, mid), jnp.float32)],
        compiler_params=pltpu.CompilerParams(
            dimension_semantics=("parallel",),
            vmem_limit_bytes=32 * 1024 * 1024),
        cost_estimate=pl.CostEstimate(flops=flops, transcendentals=0,
                                      bytes_accessed=bytes_accessed),
    )(x_shuf, params["w1"], _vec(s1), _vec(b1),
      params["dw"].reshape(K * K, mid), _vec(s2), _vec(b2),
      params["w3"], _vec(s3), _vec(b3))


def _fused_block_s2(x_nhwc, params, *, inp, oup, mid, ksize):
    """x_nhwc: (B, H, W, inp) -> (B, Ho, Wo, oup) NHWC (concat[proj, main])."""
    B, H, W, _ = x_nhwc.shape
    K = ksize
    pad = K // 2
    outputs = oup - inp
    Ho, Wo = _out_hw(H, W, K, 2)
    Hp, Wp = H + 2 * pad, W + 2 * pad
    s1, b1 = params["bn1"]
    s2, b2 = params["bn2"]
    s3, b3 = params["bn3"]
    sp1, bp1 = params["bnp1"]
    sp2, bp2 = params["bnp2"]

    kernel = functools.partial(_block_s2_kernel, K, H, W, Ho, Wo, pad)

    flops = B * (2 * K * K * Ho * Wo * inp + 2 * Ho * Wo * inp * inp   # proj
                 + 2 * H * W * inp * mid + 2 * K * K * Ho * Wo * mid   # main
                 + 2 * Ho * Wo * mid * outputs)
    bytes_accessed = 4 * (x_nhwc.size + B * Ho * Wo * oup
                          + K * K * inp + inp * inp + inp * mid
                          + K * K * mid + mid * outputs
                          + 4 * inp + 4 * mid + 2 * outputs)

    cspec = lambda C: pl.BlockSpec((1, C), lambda b: (0, 0))
    return pl.pallas_call(
        kernel,
        out_shape=jax.ShapeDtypeStruct((B, Ho, Wo, oup), jnp.float32),
        grid=(B,),
        in_specs=[
            pl.BlockSpec((1, H, W, inp), lambda b: (b, 0, 0, 0)),
            pl.BlockSpec((K * K, inp), lambda b: (0, 0)),
            cspec(inp), cspec(inp),
            pl.BlockSpec((inp, inp), lambda b: (0, 0)),
            cspec(inp), cspec(inp),
            pl.BlockSpec((inp, mid), lambda b: (0, 0)),
            cspec(mid), cspec(mid),
            pl.BlockSpec((K * K, mid), lambda b: (0, 0)),
            cspec(mid), cspec(mid),
            pl.BlockSpec((mid, outputs), lambda b: (0, 0)),
            cspec(outputs), cspec(outputs),
        ],
        out_specs=pl.BlockSpec((1, Ho, Wo, oup), lambda b: (b, 0, 0, 0)),
        scratch_shapes=[pltpu.VMEM((Hp, Wp, inp), jnp.float32),
                        pltpu.VMEM((Hp, Wp, mid), jnp.float32)],
        compiler_params=pltpu.CompilerParams(
            dimension_semantics=("parallel",),
            vmem_limit_bytes=32 * 1024 * 1024),
        cost_estimate=pl.CostEstimate(flops=flops, transcendentals=0,
                                      bytes_accessed=bytes_accessed),
    )(x_nhwc,
      params["dwp"].reshape(K * K, inp), _vec(sp1), _vec(bp1),
      params["wp"], _vec(sp2), _vec(bp2),
      params["w1"], _vec(s1), _vec(b1),
      params["dw"].reshape(K * K, mid), _vec(s2), _vec(b2),
      params["w3"], _vec(s3), _vec(b3))


# ----------------------------------------------------------------------------
# Parameter init (deterministic) and module forward
# ----------------------------------------------------------------------------

def init_params(key, inp, oup, mid, ksize, stride):
    outputs = oup - inp
    ks = iter(jax.random.split(key, 40))

    def w(shape):
        return jax.random.normal(next(ks), shape, jnp.float32) * 0.1

    def bn(C):
        gamma = jax.random.uniform(next(ks), (C,), jnp.float32, 0.5, 1.5)
        beta = jax.random.normal(next(ks), (C,), jnp.float32) * 0.1
        mean = jax.random.normal(next(ks), (C,), jnp.float32) * 0.1
        var = jax.random.uniform(next(ks), (C,), jnp.float32, 0.5, 1.5)
        scale = gamma / jnp.sqrt(var + 1e-5)
        bias = beta - mean * scale
        return scale, bias

    p = {
        "w1": w((inp, mid)),           # 1x1: inp -> mid
        "bn1": bn(mid),
        "dw": w((ksize, ksize, mid)),  # depthwise KxK on mid channels
        "bn2": bn(mid),
        "w3": w((mid, outputs)),       # 1x1: mid -> oup-inp
        "bn3": bn(outputs),
    }
    if stride == 2:
        p["dwp"] = w((ksize, ksize, inp))  # proj depthwise
        p["bnp1"] = bn(inp)
        p["wp"] = w((inp, inp))            # proj 1x1
        p["bnp2"] = bn(inp)
    return p


def shuffle_v2_block(x_nchw, params, *, inp, oup, mid, ksize, stride):
    assert stride in (1, 2)
    B, C, H, W = x_nchw.shape

    if stride == 1:
        # channel_shuffle_v2: even channels -> x_proj, odd channels -> x.
        # Fold the de-interleave into the NCHW->NHWC boundary transpose so the
        # single fused kernel gets both halves without strided-lane gathers.
        assert C == 2 * inp and C % 4 == 0
        x_shuf = jnp.transpose(x_nchw.reshape(B, inp, 2, H, W), (2, 0, 3, 4, 1))
        out_nhwc = _fused_block_s1(x_shuf, params, inp=inp, oup=oup,
                                   mid=mid, ksize=ksize)
    else:
        assert C == inp
        x_nhwc = jnp.transpose(x_nchw, (0, 2, 3, 1))
        out_nhwc = _fused_block_s2(x_nhwc, params, inp=inp, oup=oup,
                                   mid=mid, ksize=ksize)

    return jnp.transpose(out_nhwc, (0, 3, 1, 2))


# ----------------------------------------------------------------------------
# Pure-JAX reference (lax.conv) used only for the correctness check
# ----------------------------------------------------------------------------

def _conv_ref(x_nhwc, w_hwio, stride, pad, groups):
    return lax.conv_general_dilated(
        x_nhwc, w_hwio, window_strides=(stride, stride),
        padding=[(pad, pad), (pad, pad)],
        dimension_numbers=("NHWC", "HWIO", "NHWC"),
        feature_group_count=groups)


def ref_shuffle_v2_block(x_nchw, params, *, inp, oup, mid, ksize, stride):
    pad = ksize // 2
    if stride == 1:
        x_proj_nchw = x_nchw[:, 0::2]
        x_main_nchw = x_nchw[:, 1::2]
    else:
        x_proj_nchw = x_nchw
        x_main_nchw = x_nchw

    def bn_apply(y, sb):
        s, b = sb
        return y * s + b

    x = jnp.transpose(x_main_nchw, (0, 2, 3, 1))
    h = _conv_ref(x, params["w1"].reshape(1, 1, inp, mid), 1, 0, 1)
    h = jnp.maximum(bn_apply(h, params["bn1"]), 0.0)
    h = _conv_ref(h, params["dw"].reshape(ksize, ksize, 1, mid), stride, pad, mid)
    h = bn_apply(h, params["bn2"])
    h = _conv_ref(h, params["w3"].reshape(1, 1, mid, oup - inp), 1, 0, 1)
    h = jnp.maximum(bn_apply(h, params["bn3"]), 0.0)
    main_nchw = jnp.transpose(h, (0, 3, 1, 2))

    if stride == 1:
        proj_nchw = x_proj_nchw
    else:
        xp = jnp.transpose(x_proj_nchw, (0, 2, 3, 1))
        p = _conv_ref(xp, params["dwp"].reshape(ksize, ksize, 1, inp), stride, pad, inp)
        p = bn_apply(p, params["bnp1"])
        p = _conv_ref(p, params["wp"].reshape(1, 1, inp, inp), 1, 0, 1)
        p = jnp.maximum(bn_apply(p, params["bnp2"]), 0.0)
        proj_nchw = jnp.transpose(p, (0, 3, 1, 2))

    return jnp.concatenate([proj_nchw, main_nchw], axis=1)


# ----------------------------------------------------------------------------
# Main
# ----------------------------------------------------------------------------

if __name__ == "__main__":
    key = jax.random.PRNGKey(0)
    kx1, kx2, kp1, kp2 = jax.random.split(key, 4)

    inp, oup, mid, ksize = 4, 8, 8, 3

    # stride=1 block: input has 2*inp channels (channel shuffle splits it)
    x1 = jax.random.normal(kx1, (2, 2 * inp, 16, 16), jnp.float32)
    params1 = init_params(kp1, inp, oup, mid, ksize, 1)
    fwd1 = jax.jit(functools.partial(shuffle_v2_block, inp=inp, oup=oup,
                                     mid=mid, ksize=ksize, stride=1))
    out1 = jax.block_until_ready(fwd1(x1, params1))
    ref1 = ref_shuffle_v2_block(x1, params1, inp=inp, oup=oup, mid=mid,
                                ksize=ksize, stride=1)
    assert out1.shape == (2, oup, 16, 16)
    assert float(jnp.max(jnp.abs(out1 - ref1))) < 1e-4

    # stride=2 block: input has inp channels, spatial halved
    x2 = jax.random.normal(kx2, (2, inp, 16, 16), jnp.float32)
    params2 = init_params(kp2, inp, oup, mid, ksize, 2)
    fwd2 = jax.jit(functools.partial(shuffle_v2_block, inp=inp, oup=oup,
                                     mid=mid, ksize=ksize, stride=2))
    out2 = jax.block_until_ready(fwd2(x2, params2))
    ref2 = ref_shuffle_v2_block(x2, params2, inp=inp, oup=oup, mid=mid,
                                ksize=ksize, stride=2)
    assert out2.shape == (2, oup, 8, 8)
    assert float(jnp.max(jnp.abs(out2 - ref2))) < 1e-4

    print("KERNEL_OK")
</pallas_src>

<mosaic_0001>
module attributes {stable_mosaic.version = 11 : i64} {
  func.func @_block_s1_kernel(%arg0: i32, %arg1: memref<2x1x16x16x4xf32, #tpu.memory_space<vmem>>, %arg2: memref<4x8xf32, #tpu.memory_space<vmem>>, %arg3: memref<1x8xf32, #tpu.memory_space<vmem>>, %arg4: memref<1x8xf32, #tpu.memory_space<vmem>>, %arg5: memref<9x8xf32, #tpu.memory_space<vmem>>, %arg6: memref<1x8xf32, #tpu.memory_space<vmem>>, %arg7: memref<1x8xf32, #tpu.memory_space<vmem>>, %arg8: memref<8x4xf32, #tpu.memory_space<vmem>>, %arg9: memref<1x4xf32, #tpu.memory_space<vmem>>, %arg10: memref<1x4xf32, #tpu.memory_space<vmem>>, %arg11: memref<1x16x16x8xf32, #tpu.memory_space<vmem>>, %arg12: memref<18x18x8xf32, #tpu.memory_space<vmem>>) attributes {dimension_semantics = [#tpu.dimension_semantics<parallel>], iteration_bounds = array<i64: 2>, scalar_prefetch = 0 : i64, scratch_operands = 1 : i64, tpu.core_type = #tpu.core_type<tc>, window_params = [{transform_indices = @transform_0, window_bounds = array<i64: 2, 1, 16, 16, 4>}, {pipeline_mode = #tpu.pipeline_mode<synchronous>, transform_indices = @transform_1, window_bounds = array<i64: 4, 8>}, {pipeline_mode = #tpu.pipeline_mode<synchronous>, transform_indices = @transform_2, window_bounds = array<i64: 1, 8>}, {pipeline_mode = #tpu.pipeline_mode<synchronous>, transform_indices = @transform_3, window_bounds = array<i64: 1, 8>}, {pipeline_mode = #tpu.pipeline_mode<synchronous>, transform_indices = @transform_4, window_bounds = array<i64: 9, 8>}, {pipeline_mode = #tpu.pipeline_mode<synchronous>, transform_indices = @transform_5, window_bounds = array<i64: 1, 8>}, {pipeline_mode = #tpu.pipeline_mode<synchronous>, transform_indices = @transform_6, window_bounds = array<i64: 1, 8>}, {pipeline_mode = #tpu.pipeline_mode<synchronous>, transform_indices = @transform_7, window_bounds = array<i64: 8, 4>}, {pipeline_mode = #tpu.pipeline_mode<synchronous>, transform_indices = @transform_8, window_bounds = array<i64: 1, 4>}, {pipeline_mode = #tpu.pipeline_mode<synchronous>, transform_indices = @transform_9, window_bounds = array<i64: 1, 4>}, {transform_indices = @transform_10, window_bounds = array<i64: 1, 16, 16, 8>}]} {
    %c1 = arith.constant 1 : index
    %c0 = arith.constant 0 : index
    %c0_0 = arith.constant 0 : index
    %c0_1 = arith.constant 0 : index
    %c0_2 = arith.constant 0 : index
    %0 = vector.load %arg1[%c1, %c0, %c0_0, %c0_1, %c0_2] : memref<2x1x16x16x4xf32, #tpu.memory_space<vmem>>, vector<1x1x16x16x4xf32>
    %1 = vector.shape_cast %0 : vector<1x1x16x16x4xf32> to vector<16x16x4xf32>
    %cst = arith.constant 0.000000e+00 : f32
    %2 = vector.broadcast %cst : f32 to vector<18x18x8xf32>
    %c0_3 = arith.constant 0 : index
    %c0_4 = arith.constant 0 : index
    %c0_5 = arith.constant 0 : index
    %3 = vector.load %arg12[%c0_3, %c0_4, %c0_5] : memref<18x18x8xf32, #tpu.memory_space<vmem>>, vector<18x18x8xf32>
    tpu.vector_store %arg12[%c0_3, %c0_4, %c0_5], %2 {strides = array<i32>} : memref<18x18x8xf32, #tpu.memory_space<vmem>>, vector<18x18x8xf32>,
    %4 = vector.shape_cast %1 : vector<16x16x4xf32> to vector<256x4xf32>
    %c0_6 = arith.constant 0 : index
    %c0_7 = arith.constant 0 : index
    %5 = vector.load %arg2[%c0_6, %c0_7] : memref<4x8xf32, #tpu.memory_space<vmem>>, vector<4x8xf32>
    %cst_8 = arith.constant dense<0.000000e+00> : vector<256x8xf32>
    %6 = tpu.matmul %4, %5, %cst_8 {dimension_numbers = #tpu.dot_dimension_numbers<[1], [0], [0], [1], [0, 0, 1, 1], [], []>} : vector<256x4xf32>, vector<4x8xf32>, vector<256x8xf32> -> vector<256x8xf32>
    %c0_9 = arith.constant 0 : index
    %c0_10 = arith.constant 0 : index
    %7 = vector.load %arg3[%c0_9, %c0_10] : memref<1x8xf32, #tpu.memory_space<vmem>>, vector<1x8xf32>
    %8 = vector.broadcast %7 : vector<1x8xf32> to vector<256x8xf32>
    %9 = arith.mulf %6, %8 : vector<256x8xf32>
    %c0_11 = arith.constant 0 : index
    %c0_12 = arith.constant 0 : index
    %10 = vector.load %arg4[%c0_11, %c0_12] : memref<1x8xf32, #tpu.memory_space<vmem>>, vector<1x8xf32>
    %11 = vector.broadcast %10 : vector<1x8xf32> to vector<256x8xf32>
    %12 = arith.addf %9, %11 : vector<256x8xf32>
    %cst_13 = arith.constant 0.000000e+00 : f32
    %13 = vector.broadcast %cst_13 : f32 to vector<256x8xf32>
    %14 = arith.maximumf %12, %13 : vector<256x8xf32>
    %15 = vector.shape_cast %14 : vector<256x8xf32> to vector<16x16x8xf32>
    %c1_14 = arith.constant 1 : index
    %c1_15 = arith.constant 1 : index
    %c0_16 = arith.constant 0 : index
    %16 = vector.load %arg12[%c1_14, %c1_15, %c0_16] : memref<18x18x8xf32, #tpu.memory_space<vmem>>, vector<16x16x8xf32>
    tpu.vector_store %arg12[%c1_14, %c1_15, %c0_16], %15 {strides = array<i32>} : memref<18x18x8xf32, #tpu.memory_space<vmem>>, vector<16x16x8xf32>,
    %cst_17 = arith.constant 0.000000e+00 : f32
    %17 = vector.broadcast %cst_17 : f32 to vector<16x16x8xf32>
    %c0_18 = arith.constant 0 : index
    %c0_19 = arith.constant 0 : index
    %c0_20 = arith.constant 0 : index
    %18 = vector.load %arg12[%c0_18, %c0_19, %c0_20] : memref<18x18x8xf32, #tpu.memory_space<vmem>>, vector<16x16x8xf32>
    %c0_21 = arith.constant 0 : index
    %c0_22 = arith.constant 0 : index
    %19 = vector.load %arg5[%c0_21, %c0_22] : memref<9x8xf32, #tpu.memory_space<vmem>>, vector<1x8xf32>
    %20 = vector.shape_cast %19 : vector<1x8xf32> to vector<1x1x8xf32>
    %21 = vector.broadcast %20 : vector<1x1x8xf32> to vector<16x16x8xf32>
    %22 = arith.mulf %18, %21 : vector<16x16x8xf32>
    %23 = arith.addf %17, %22 : vector<16x16x8xf32>
    %c0_23 = arith.constant 0 : index
    %c1_24 = arith.constant 1 : index
    %c0_25 = arith.constant 0 : index
    %24 = vector.load %arg12[%c0_23, %c1_24, %c0_25] : memref<18x18x8xf32, #tpu.memory_space<vmem>>, vector<16x16x8xf32>
    %c1_26 = arith.constant 1 : index
    %c0_27 = arith.constant 0 : index
    %25 = vector.load %arg5[%c1_26, %c0_27] : memref<9x8xf32, #tpu.memory_space<vmem>>, vector<1x8xf32>
    %26 = vector.shape_cast %25 : vector<1x8xf32> to vector<1x1x8xf32>
    %27 = vector.broadcast %26 : vector<1x1x8xf32> to vector<16x16x8xf32>
    %28 = arith.mulf %24, %27 : vector<16x16x8xf32>
    %29 = arith.addf %23, %28 : vector<16x16x8xf32>
    %c0_28 = arith.constant 0 : index
    %c2 = arith.constant 2 : index
    %c0_29 = arith.constant 0 : index
    %30 = vector.load %arg12[%c0_28, %c2, %c0_29] : memref<18x18x8xf32, #tpu.memory_space<vmem>>, vector<16x16x8xf32>
    %c2_30 = arith.constant 2 : index
    %c0_31 = arith.constant 0 : index
    %31 = vector.load %arg5[%c2_30, %c0_31] : memref<9x8xf32, #tpu.memory_space<vmem>>, vector<1x8xf32>
    %32 = vector.shape_cast %31 : vector<1x8xf32> to vector<1x1x8xf32>
    %33 = vector.broadcast %32 : vector<1x1x8xf32> to vector<16x16x8xf32>
    %34 = arith.mulf %30, %33 : vector<16x16x8xf32>
    %35 = arith.addf %29, %34 : vector<16x16x8xf32>
    %c1_32 = arith.constant 1 : index
    %c0_33 = arith.constant 0 : index
    %c0_34 = arith.constant 0 : index
    %36 = vector.load %arg12[%c1_32, %c0_33, %c0_34] : memref<18x18x8xf32, #tpu.memory_space<vmem>>, vector<16x16x8xf32>
    %c3 = arith.constant 3 : index
    %c0_35 = arith.constant 0 : index
    %37 = vector.load %arg5[%c3, %c0_35] : memref<9x8xf32, #tpu.memory_space<vmem>>, vector<1x8xf32>
    %38 = vector.shape_cast %37 : vector<1x8xf32> to vector<1x1x8xf32>
    %39 = vector.broadcast %38 : vector<1x1x8xf32> to vector<16x16x8xf32>
    %40 = arith.mulf %36, %39 : vector<16x16x8xf32>
    %41 = arith.addf %35, %40 : vector<16x16x8xf32>
    %c1_36 = arith.constant 1 : index
    %c1_37 = arith.constant 1 : index
    %c0_38 = arith.constant 0 : index
    %42 = vector.load %arg12[%c1_36, %c1_37, %c0_38] : memref<18x18x8xf32, #tpu.memory_space<vmem>>, vector<16x16x8xf32>
    %c4 = arith.constant 4 : index
    %c0_39 = arith.constant 0 : index
    %43 = vector.load %arg5[%c4, %c0_39] : memref<9x8xf32, #tpu.memory_space<vmem>>, vector<1x8xf32>
    %44 = vector.shape_cast %43 : vector<1x8xf32> to vector<1x1x8xf32>
    %45 = vector.broadcast %44 : vector<1x1x8xf32> to vector<16x16x8xf32>
    %46 = arith.mulf %42, %45 : vector<16x16x8xf32>
    %47 = arith.addf %41, %46 : vector<16x16x8xf32>
    %c1_40 = arith.constant 1 : index
    %c2_41 = arith.constant 2 : index
    %c0_42 = arith.constant 0 : index
    %48 = vector.load %arg12[%c1_40, %c2_41, %c0_42] : memref<18x18x8xf32, #tpu.memory_space<vmem>>, vector<16x16x8xf32>
    %c5 = arith.constant 5 : index
    %c0_43 = arith.constant 0 : index
    %49 = vector.load %arg5[%c5, %c0_43] : memref<9x8xf32, #tpu.memory_space<vmem>>, vector<1x8xf32>
    %50 = vector.shape_cast %49 : vector<1x8xf32> to vector<1x1x8xf32>
    %51 = vector.broadcast %50 : vector<1x1x8xf32> to vector<16x16x8xf32>
    %52 = arith.mulf %48, %51 : vector<16x16x8xf32>
    %53 = arith.addf %47, %52 : vector<16x16x8xf32>
    %c2_44 = arith.constant 2 : index
    %c0_45 = arith.constant 0 : index
    %c0_46 = arith.constant 0 : index
    %54 = vector.load %arg12[%c2_44, %c0_45, %c0_46] : memref<18x18x8xf32, #tpu.memory_space<vmem>>, vector<16x16x8xf32>
    %c6 = arith.constant 6 : index
    %c0_47 = arith.constant 0 : index
    %55 = vector.load %arg5[%c6, %c0_47] : memref<9x8xf32, #tpu.memory_space<vmem>>, vector<1x8xf32>
    %56 = vector.shape_cast %55 : vector<1x8xf32> to vector<1x1x8xf32>
    %57 = vector.broadcast %56 : vector<1x1x8xf32> to vector<16x16x8xf32>
    %58 = arith.mulf %54, %57 : vector<16x16x8xf32>
    %59 = arith.addf %53, %58 : vector<16x16x8xf32>
    %c2_48 = arith.constant 2 : index
    %c1_49 = arith.constant 1 : index
    %c0_50 = arith.constant 0 : index
    %60 = vector.load %arg12[%c2_48, %c1_49, %c0_50] : memref<18x18x8xf32, #tpu.memory_space<vmem>>, vector<16x16x8xf32>
    %c7 = arith.constant 7 : index
    %c0_51 = arith.constant 0 : index
    %61 = vector.load %arg5[%c7, %c0_51] : memref<9x8xf32, #tpu.memory_space<vmem>>, vector<1x8xf32>
    %62 = vector.shape_cast %61 : vector<1x8xf32> to vector<1x1x8xf32>
    %63 = vector.broadcast %62 : vector<1x1x8xf32> to vector<16x16x8xf32>
    %64 = arith.mulf %60, %63 : vector<16x16x8xf32>
    %65 = arith.addf %59, %64 : vector<16x16x8xf32>
    %c2_52 = arith.constant 2 : index
    %c2_53 = arith.constant 2 : index
    %c0_54 = arith.constant 0 : index
    %66 = vector.load %arg12[%c2_52, %c2_53, %c0_54] : memref<18x18x8xf32, #tpu.memory_space<vmem>>, vector<16x16x8xf32>
    %c8 = arith.constant 8 : index
    %c0_55 = arith.constant 0 : index
    %67 = vector.load %arg5[%c8, %c0_55] : memref<9x8xf32, #tpu.memory_space<vmem>>, vector<1x8xf32>
    %68 = vector.shape_cast %67 : vector<1x8xf32> to vector<1x1x8xf32>
    %69 = vector.broadcast %68 : vector<1x1x8xf32> to vector<16x16x8xf32>
    %70 = arith.mulf %66, %69 : vector<16x16x8xf32>
    %71 = arith.addf %65, %70 : vector<16x16x8xf32>
    %c0_56 = arith.constant 0 : index
    %c0_57 = arith.constant 0 : index
    %72 = vector.load %arg6[%c0_56, %c0_57] : memref<1x8xf32, #tpu.memory_space<vmem>>, vector<1x8xf32>
    %73 = vector.shape_cast %72 : vector<1x8xf32> to vector<1x1x8xf32>
    %74 = vector.broadcast %73 : vector<1x1x8xf32> to vector<16x16x8xf32>
    %75 = arith.mulf %71, %74 : vector<16x16x8xf32>
    %c0_58 = arith.constant 0 : index
    %c0_59 = arith.constant 0 : index
    %76 = vector.load %arg7[%c0_58, %c0_59] : memref<1x8xf32, #tpu.memory_space<vmem>>, vector<1x8xf32>
    %77 = vector.shape_cast %76 : vector<1x8xf32> to vector<1x1x8xf32>
    %78 = vector.broadcast %77 : vector<1x1x8xf32> to vector<16x16x8xf32>
    %79 = arith.addf %75, %78 : vector<16x16x8xf32>
    %80 = vector.shape_cast %79 : vector<16x16x8xf32> to vector<256x8xf32>
    %c0_60 = arith.constant 0 : index
    %c0_61 = arith.constant 0 : index
    %81 = vector.load %arg8[%c0_60, %c0_61] : memref<8x4xf32, #tpu.memory_space<vmem>>, vector<8x4xf32>
    %cst_62 = arith.constant dense<0.000000e+00> : vector<256x4xf32>
    %82 = tpu.matmul %80, %81, %cst_62 {dimension_numbers = #tpu.dot_dimension_numbers<[1], [0], [0], [1], [0, 0, 1, 1], [], []>} : vector<256x8xf32>, vector<8x4xf32>, vector<256x4xf32> -> vector<256x4xf32>
    %c0_63 = arith.constant 0 : index
    %c0_64 = arith.constant 0 : index
    %83 = vector.load %arg9[%c0_63, %c0_64] : memref<1x4xf32, #tpu.memory_space<vmem>>, vector<1x4xf32>
    %84 = vector.broadcast %83 : vector<1x4xf32> to vector<256x4xf32>
    %85 = arith.mulf %82, %84 : vector<256x4xf32>
    %c0_65 = arith.constant 0 : index
    %c0_66 = arith.constant 0 : index
    %86 = vector.load %arg10[%c0_65, %c0_66] : memref<1x4xf32, #tpu.memory_space<vmem>>, vector<1x4xf32>
    %87 = vector.broadcast %86 : vector<1x4xf32> to vector<256x4xf32>
    %88 = arith.addf %85, %87 : vector<256x4xf32>
    %cst_67 = arith.constant 0.000000e+00 : f32
    %89 = vector.broadcast %cst_67 : f32 to vector<256x4xf32>
    %90 = arith.maximumf %88, %89 : vector<256x4xf32>
    %91 = vector.shape_cast %90 : vector<256x4xf32> to vector<16x16x4xf32>
    %c0_68 = arith.constant 0 : index
    %c0_69 = arith.constant 0 : index
    %c0_70 = arith.constant 0 : index
    %c0_71 = arith.constant 0 : index
    %c0_72 = arith.constant 0 : index
    %92 = vector.load %arg1[%c0_68, %c0_69, %c0_70, %c0_71, %c0_72] : memref<2x1x16x16x4xf32, #tpu.memory_space<vmem>>, vector<1x1x16x16x4xf32>
    %93 = vector.shape_cast %92 : vector<1x1x16x16x4xf32> to vector<16x16x4xf32>
    %94 = tpu.concatenate %93, %91 in 2 : vector<16x16x4xf32>, vector<16x16x4xf32> -> vector<16x16x8xf32>
    %c0_73 = arith.constant 0 : index
    %c0_74 = arith.constant 0 : index
    %c0_75 = arith.constant 0 : index
    %c0_76 = arith.constant 0 : index
    %95 = vector.load %arg11[%c0_73, %c0_74, %c0_75, %c0_76] : memref<1x16x16x8xf32, #tpu.memory_space<vmem>>, vector<1x16x16x8xf32>
    %96 = vector.shape_cast %95 : vector<1x16x16x8xf32> to vector<16x16x8xf32>
    %97 = vector.shape_cast %94 : vector<16x16x8xf32> to vector<1x16x16x8xf32>
    tpu.vector_store %arg11[%c0_73, %c0_74, %c0_75, %c0_76], %97 {strides = array<i32>} : memref<1x16x16x8xf32, #tpu.memory_space<vmem>>, vector<1x16x16x8xf32>,
    return
  }
  func.func @transform_0(%arg0: i32) -> (i32, i32, i32, i32, i32) {
    %c0_i32 = arith.constant 0 : i32
    %c0_i32_0 = arith.constant 0 : i32
    %c0_i32_1 = arith.constant 0 : i32
    %c0_i32_2 = arith.constant 0 : i32
    %c0_i32_3 = arith.constant 0 : i32
    return %c0_i32, %arg0, %c0_i32_0, %c0_i32_1, %c0_i32_2 : i32, i32, i32, i32, i32
  }
  func.func @transform_1(%arg0: i32) -> (i32, i32) {
    %c0_i32 = arith.constant 0 : i32
    %c0_i32_0 = arith.constant 0 : i32
    %c0_i32_1 = arith.constant 0 : i32
    return %c0_i32, %c0_i32_0 : i32, i32
  }
  func.func @transform_2(%arg0: i32) -> (i32, i32) {
    %c0_i32 = arith.constant 0 : i32
    %c0_i32_0 = arith.constant 0 : i32
    %c0_i32_1 = arith.constant 0 : i32
    return %c0_i32, %c0_i32_0 : i32, i32
  }
  func.func @transform_3(%arg0: i32) -> (i32, i32) {
    %c0_i32 = arith.constant 0 : i32
    %c0_i32_0 = arith.constant 0 : i32
    %c0_i32_1 = arith.constant 0 : i32
    return %c0_i32, %c0_i32_0 : i32, i32
  }
  func.func @transform_4(%arg0: i32) -> (i32, i32) {
    %c0_i32 = arith.constant 0 : i32
    %c0_i32_0 = arith.constant 0 : i32
    %c0_i32_1 = arith.constant 0 : i32
    return %c0_i32, %c0_i32_0 : i32, i32
  }
  func.func @transform_5(%arg0: i32) -> (i32, i32) {
    %c0_i32 = arith.constant 0 : i32
    %c0_i32_0 = arith.constant 0 : i32
    %c0_i32_1 = arith.constant 0 : i32
    return %c0_i32, %c0_i32_0 : i32, i32
  }
  func.func @transform_6(%arg0: i32) -> (i32, i32) {
    %c0_i32 = arith.constant 0 : i32
    %c0_i32_0 = arith.constant 0 : i32
    %c0_i32_1 = arith.constant 0 : i32
    return %c0_i32, %c0_i32_0 : i32, i32
  }
  func.func @transform_7(%arg0: i32) -> (i32, i32) {
    %c0_i32 = arith.constant 0 : i32
    %c0_i32_0 = arith.constant 0 : i32
    %c0_i32_1 = arith.constant 0 : i32
    return %c0_i32, %c0_i32_0 : i32, i32
  }
  func.func @transform_8(%arg0: i32) -> (i32, i32) {
    %c0_i32 = arith.constant 0 : i32
    %c0_i32_0 = arith.constant 0 : i32
    %c0_i32_1 = arith.constant 0 : i32
    return %c0_i32, %c0_i32_0 : i32, i32
  }
  func.func @transform_9(%arg0: i32) -> (i32, i32) {
    %c0_i32 = arith.constant 0 : i32
    %c0_i32_0 = arith.constant 0 : i32
    %c0_i32_1 = arith.constant 0 : i32
    return %c0_i32, %c0_i32_0 : i32, i32
  }
  func.func @transform_10(%arg0: i32) -> (i32, i32, i32, i32) {
    %c0_i32 = arith.constant 0 : i32
    %c0_i32_0 = arith.constant 0 : i32
    %c0_i32_1 = arith.constant 0 : i32
    %c0_i32_2 = arith.constant 0 : i32
    return %arg0, %c0_i32, %c0_i32_0, %c0_i32_1 : i32, i32, i32, i32
  }
}

</mosaic_0001>

<bundles_post_ra>
// kernel: shuffle_v2_block.1
= control target key start
LH: loop header
LB: loop body
LE: loop exit
PB: predicated region body
PF: predicated region fallthrough
CT: control target
= control target key end

     0   :  { %s3322_s13 = smov 0   ;;  %s3324_s14 = smov 0   ;;  %s4712_s0 = inlined_call_operand.vmem [shape: f32[2,2,16,16,4], index: 0, kind: input, shape index: {}]   ;;  %s4713_s1 = inlined_call_operand.vmem [shape: f32[4,8], index: 1, kind: input, shape index: {}]   ;;  %s4714_s2 = inlined_call_operand.vmem [shape: f32[1,8], index: 2, kind: input, shape index: {}]   ;;  %s4715_s3 = inlined_call_operand.vmem [shape: f32[1,8], index: 3, kind: input, shape index: {}]   ;;  %s4716_s4 = inlined_call_operand.vmem [shape: f32[9,8], index: 4, kind: input, shape index: {}]   ;;  %s4717_s5 = inlined_call_operand.vmem [shape: f32[1,8], index: 5, kind: input, shape index: {}]   ;;  %s4718_s6 = inlined_call_operand.vmem [shape: f32[1,8], index: 6, kind: input, shape index: {}]   ;;  %s4719_s7 = inlined_call_operand.vmem [shape: f32[8,4], index: 7, kind: input, shape index: {}]   ;;  %s4720_s8 = inlined_call_operand.vmem [shape: f32[1,4], index: 8, kind: input, shape index: {}]   ;;  %s4721_s9 = inlined_call_operand.vmem [shape: f32[1,4], index: 9, kind: input, shape index: {}]   ;;  %s4722_s10 = inlined_call_operand.vmem [shape: f32[2,16,16,8], index: 10, kind: output, shape index: {}]  }
   0x1   :  { %s3326_s15 = smov 0  }
   0x2 LB: > { %s2911_s16 = sadd.s32 4294967295, %s3263_s15   ;;  %s3339_s17 = sadd.s32 1, %s3263_s15   ;;  %s3263_s15 = sphi %s3326_s15, %s4725_s15   ;;  %s3259_s14 = sphi %s3324_s14, %s4724_s14   ;;  %s3255_s13 = sphi %s3322_s13, %s4723_s13  }
   0x3   : > { %s24_s18 = ssub.s32 %s3263_s15, %s3339_s17  ;;  %s27_s19 = sadd.s32 1, %s3259_s14 }
   0x4   : > { %p25_p0 = scmp.eq.s32.totalorder %s24_s18, 0  ;;  %p34_p1 = scmp.ne.s32.totalorder %s3259_s14, %s3255_s13 }
   0x5   : > { %p35_p2 = scmp.eq.s32.totalorder %s3263_s15, 0  ;;  %p2914_p4 = scmp.ge.s32.totalorder %s3263_s15, 2 }
   0x6   : > { %s3348_s20 = scalar_select %p25_p0, %s3259_s14, %s27_s19  }
   0x7   : > { %p36_p3 = por %p35_p2, %p34_p1  ;;  %302 = sbr.rel (%p2914_p4) target bundleno = 50 (0x32), region = 52 }
   0xe   : > { %305 = sbr.rel (!%p36_p3) target bundleno = 50 (0x32), region = 56  ;;  %s307_s21 = sand.u32 (%p36_p3), 1, %s3259_s14  }
   0xf   : > { %s3036_s22 = sshll.u32 (%p36_p3), %s3263_s15, 8  ;;  %s2915_s23 = sshll.u32 (%p36_p3), %s307_s21, 9 }
  0x10   : > { %s3356_s26 = scalar_lea.vmem (%p36_p3), %s4712_s0, %s3036_s22  ;;  %s3361_s27 = scalar_lea.vmem (%p36_p3), [#allocation3], %s2915_s23 }
  0x11   : > { %v466_v0 = vld [vmem:[%s3356_s26] sm:$0xff] (%p36_p3)  ;;  %v468_v1 = vld [vmem:[%s3356_s26 + $0x8] sm:$0xff] (%p36_p3)  ;;  %v470_v2 = vld [vmem:[%s3356_s26 + $0x10] sm:$0xff] (%p36_p3) }
  0x12   : > { %467 = vst [vmem:[%s3361_s27] sm:$0xff] (%p36_p3), %v466_v0  ;;  %469 = vst [vmem:[%s3361_s27 + $0x8] sm:$0xff] (%p36_p3), %v468_v1  ;;  %v472_v3 = vld [vmem:[%s3356_s26 + $0x18] sm:$0xff] (%p36_p3)  ;;  %v474_v4 = vld [vmem:[%s3356_s26 + $0x20] sm:$0xff] (%p36_p3) }
  0x13   : > { %471 = vst [vmem:[%s3361_s27 + $0x10] sm:$0xff] (%p36_p3), %v470_v2  ;;  %v476_v5 = vld [vmem:[%s3356_s26 + $0x28] sm:$0xff] (%p36_p3)  ;;  %473 = vst [vmem:[%s3361_s27 + $0x18] sm:$0xff] (%p36_p3), %v472_v3  ;;  %v478_v6 = vld [vmem:[%s3356_s26 + $0x30] sm:$0xff] (%p36_p3) }
  0x14   : > { %475 = vst [vmem:[%s3361_s27 + $0x20] sm:$0xff] (%p36_p3), %v474_v4  ;;  %477 = vst [vmem:[%s3361_s27 + $0x28] sm:$0xff] (%p36_p3), %v476_v5  ;;  %v480_v7 = vld [vmem:[%s3356_s26 + $0x38] sm:$0xff] (%p36_p3)  ;;  %v482_v8 = vld [vmem:[%s3356_s26 + $0x40] sm:$0xff] (%p36_p3) }
  0x15   : > { %479 = vst [vmem:[%s3361_s27 + $0x30] sm:$0xff] %v478_v6  ;;  %481 = vst [vmem:[%s3361_s27 + $0x38] sm:$0xff] %v480_v7  ;;  %v484_v9 = vld [vmem:[%s3356_s26 + $0x48] sm:$0xff]  ;;  %v486_v10 = vld [vmem:[%s3356_s26 + $0x50] sm:$0xff] }
  0x16   : > { %483 = vst [vmem:[%s3361_s27 + $0x40] sm:$0xff] %v482_v8  ;;  %v488_v11 = vld [vmem:[%s3356_s26 + $0x58] sm:$0xff]  ;;  %485 = vst [vmem:[%s3361_s27 + $0x48] sm:$0xff] %v484_v9  ;;  %v490_v12 = vld [vmem:[%s3356_s26 + $0x60] sm:$0xff] }
  0x17   : > { %487 = vst [vmem:[%s3361_s27 + $0x50] sm:$0xff] %v486_v10  ;;  %489 = vst [vmem:[%s3361_s27 + $0x58] sm:$0xff] %v488_v11  ;;  %v492_v13 = vld [vmem:[%s3356_s26 + $0x68] sm:$0xff]  ;;  %v494_v14 = vld [vmem:[%s3356_s26 + $0x70] sm:$0xff] }
  0x18   : > { %491 = vst [vmem:[%s3361_s27 + $0x60] sm:$0xff] %v490_v12  ;;  %493 = vst [vmem:[%s3361_s27 + $0x68] sm:$0xff] %v492_v13  ;;  %v496_v15 = vld [vmem:[%s3356_s26 + $0x78] sm:$0xff]  ;;  %v498_v16 = vld [vmem:[%s3356_s26 + $0x80] sm:$0xff] }
  0x19   : > { %495 = vst [vmem:[%s3361_s27 + $0x70] sm:$0xff] %v494_v14  ;;  %v500_v17 = vld [vmem:[%s3356_s26 + $0x88] sm:$0xff]  ;;  %497 = vst [vmem:[%s3361_s27 + $0x78] sm:$0xff] %v496_v15  ;;  %v502_v18 = vld [vmem:[%s3356_s26 + $0x90] sm:$0xff] }
  0x1a   : > { %499 = vst [vmem:[%s3361_s27 + $0x80] sm:$0xff] %v498_v16  ;;  %501 = vst [vmem:[%s3361_s27 + $0x88] sm:$0xff] %v500_v17  ;;  %v504_v19 = vld [vmem:[%s3356_s26 + $0x98] sm:$0xff]  ;;  %v506_v20 = vld [vmem:[%s3356_s26 + $0xa0] sm:$0xff] }
  0x1b   : > { %503 = vst [vmem:[%s3361_s27 + $0x90] sm:$0xff] %v502_v18  ;;  %505 = vst [vmem:[%s3361_s27 + $0x98] sm:$0xff] %v504_v19  ;;  %v508_v21 = vld [vmem:[%s3356_s26 + $0xa8] sm:$0xff]  ;;  %v510_v22 = vld [vmem:[%s3356_s26 + $0xb0] sm:$0xff] }
  0x1c   : > { %507 = vst [vmem:[%s3361_s27 + $0xa0] sm:$0xff] %v506_v20  ;;  %v512_v23 = vld [vmem:[%s3356_s26 + $0xb8] sm:$0xff]  ;;  %509 = vst [vmem:[%s3361_s27 + $0xa8] sm:$0xff] %v508_v21  ;;  %v514_v24 = vld [vmem:[%s3356_s26 + $0xc0] sm:$0xff] }
  0x1d   : > { %511 = vst [vmem:[%s3361_s27 + $0xb0] sm:$0xff] %v510_v22  ;;  %513 = vst [vmem:[%s3361_s27 + $0xb8] sm:$0xff] %v512_v23  ;;  %v516_v25 = vld [vmem:[%s3356_s26 + $0xc8] sm:$0xff]  ;;  %v518_v26 = vld [vmem:[%s3356_s26 + $0xd0] sm:$0xff] }
  0x1e   : > { %515 = vst [vmem:[%s3361_s27 + $0xc0] sm:$0xff] %v514_v24  ;;  %517 = vst [vmem:[%s3361_s27 + $0xc8] sm:$0xff] %v516_v25  ;;  %v520_v27 = vld [vmem:[%s3356_s26 + $0xd8] sm:$0xff]  ;;  %v522_v28 = vld [vmem:[%s3356_s26 + $0xe0] sm:$0xff] }
  0x1f   : > { %519 = vst [vmem:[%s3361_s27 + $0xd0] sm:$0xff] %v518_v26  ;;  %v524_v29 = vld [vmem:[%s3356_s26 + $0xe8] sm:$0xff]  ;;  %521 = vst [vmem:[%s3361_s27 + $0xd8] sm:$0xff] %v520_v27  ;;  %v526_v30 = vld [vmem:[%s3356_s26 + $0xf0] sm:$0xff] }
  0x20   : > { %523 = vst [vmem:[%s3361_s27 + $0xe0] sm:$0xff] %v522_v28  ;;  %525 = vst [vmem:[%s3361_s27 + $0xe8] sm:$0xff] %v524_v29  ;;  %v528_v31 = vld [vmem:[%s3356_s26 + $0xf8] sm:$0xff]  ;;  %v530_v32 = vld [vmem:[%s3356_s26 + $0x200] sm:$0xff] }
  0x21   : > { %527 = vst [vmem:[%s3361_s27 + $0xf0] sm:$0xff] %v526_v30  ;;  %529 = vst [vmem:[%s3361_s27 + $0xf8] sm:$0xff] %v528_v31  ;;  %v532_v33 = vld [vmem:[%s3356_s26 + $0x208] sm:$0xff]  ;;  %v534_v34 = vld [vmem:[%s3356_s26 + $0x210] sm:$0xff] }
  0x22   : > { %531 = vst [vmem:[%s3361_s27 + $0x100] sm:$0xff] %v530_v32  ;;  %v536_v35 = vld [vmem:[%s3356_s26 + $0x218] sm:$0xff]  ;;  %533 = vst [vmem:[%s3361_s27 + $0x108] sm:$0xff] %v532_v33  ;;  %v538_v36 = vld [vmem:[%s3356_s26 + $0x220] sm:$0xff] }
  0x23   : > { %535 = vst [vmem:[%s3361_s27 + $0x110] sm:$0xff] %v534_v34  ;;  %537 = vst [vmem:[%s3361_s27 + $0x118] sm:$0xff] %v536_v35  ;;  %v540_v37 = vld [vmem:[%s3356_s26 + $0x228] sm:$0xff]  ;;  %v542_v38 = vld [vmem:[%s3356_s26 + $0x230] sm:$0xff] }
  0x24   : > { %539 = vst [vmem:[%s3361_s27 + $0x120] sm:$0xff] %v538_v36  ;;  %541 = vst [vmem:[%s3361_s27 + $0x128] sm:$0xff] %v540_v37  ;;  %v544_v39 = vld [vmem:[%s3356_s26 + $0x238] sm:$0xff]  ;;  %v546_v40 = vld [vmem:[%s3356_s26 + $0x240] sm:$0xff] }
  0x25   : > { %543 = vst [vmem:[%s3361_s27 + $0x130] sm:$0xff] %v542_v38  ;;  %v548_v41 = vld [vmem:[%s3356_s26 + $0x248] sm:$0xff]  ;;  %545 = vst [vmem:[%s3361_s27 + $0x138] sm:$0xff] %v544_v39  ;;  %v550_v42 = vld [vmem:[%s3356_s26 + $0x250] sm:$0xff] }
  0x26   : > { %547 = vst [vmem:[%s3361_s27 + $0x140] sm:$0xff] %v546_v40  ;;  %549 = vst [vmem:[%s3361_s27 + $0x148] sm:$0xff] %v548_v41  ;;  %v552_v43 = vld [vmem:[%s3356_s26 + $0x258] sm:$0xff]  ;;  %v554_v44 = vld [vmem:[%s3356_s26 + $0x260] sm:$0xff] }
  0x27   : > { %551 = vst [vmem:[%s3361_s27 + $0x150] sm:$0xff] %v550_v42  ;;  %553 = vst [vmem:[%s3361_s27 + $0x158] sm:$0xff] %v552_v43  ;;  %v556_v45 = vld [vmem:[%s3356_s26 + $0x268] sm:$0xff]  ;;  %v558_v46 = vld [vmem:[%s3356_s26 + $0x270] sm:$0xff] }
  0x28   : > { %555 = vst [vmem:[%s3361_s27 + $0x160] sm:$0xff] %v554_v44  ;;  %v560_v47 = vld [vmem:[%s3356_s26 + $0x278] sm:$0xff]  ;;  %557 = vst [vmem:[%s3361_s27 + $0x168] sm:$0xff] %v556_v45  ;;  %v562_v48 = vld [vmem:[%s3356_s26 + $0x280] sm:$0xff] }
  0x29   : > { %559 = vst [vmem:[%s3361_s27 + $0x170] sm:$0xff] %v558_v46  ;;  %561 = vst [vmem:[%s3361_s27 + $0x178] sm:$0xff] %v560_v47  ;;  %v564_v49 = vld [vmem:[%s3356_s26 + $0x288] sm:$0xff]  ;;  %v566_v50 = vld [vmem:[%s3356_s26 + $0x290] sm:$0xff] }
  0x2a   : > { %563 = vst [vmem:[%s3361_s27 + $0x180] sm:$0xff] %v562_v48  ;;  %565 = vst [vmem:[%s3361_s27 + $0x188] sm:$0xff] %v564_v49  ;;  %v568_v51 = vld [vmem:[%s3356_s26 + $0x298] sm:$0xff]  ;;  %v570_v52 = vld [vmem:[%s3356_s26 + $0x2a0] sm:$0xff] }
  0x2b   : > { %567 = vst [vmem:[%s3361_s27 + $0x190] sm:$0xff] %v566_v50  ;;  %v572_v53 = vld [vmem:[%s3356_s26 + $0x2a8] sm:$0xff]  ;;  %569 = vst [vmem:[%s3361_s27 + $0x198] sm:$0xff] %v568_v51  ;;  %v574_v54 = vld [vmem:[%s3356_s26 + $0x2b0] sm:$0xff] }
  0x2c   : > { %571 = vst [vmem:[%s3361_s27 + $0x1a0] sm:$0xff] %v570_v52  ;;  %573 = vst [vmem:[%s3361_s27 + $0x1a8] sm:$0xff] %v572_v53  ;;  %v576_v55 = vld [vmem:[%s3356_s26 + $0x2b8] sm:$0xff]  ;;  %v578_v56 = vld [vmem:[%s3356_s26 + $0x2c0] sm:$0xff] }
  0x2d   : > { %575 = vst [vmem:[%s3361_s27 + $0x1b0] sm:$0xff] %v574_v54  ;;  %577 = vst [vmem:[%s3361_s27 + $0x1b8] sm:$0xff] %v576_v55  ;;  %v580_v57 = vld [vmem:[%s3356_s26 + $0x2c8] sm:$0xff]  ;;  %v582_v58 = vld [vmem:[%s3356_s26 + $0x2d0] sm:$0xff] }
  0x2e   : > { %579 = vst [vmem:[%s3361_s27 + $0x1c0] sm:$0xff] %v578_v56  ;;  %v584_v59 = vld [vmem:[%s3356_s26 + $0x2d8] sm:$0xff]  ;;  %581 = vst [vmem:[%s3361_s27 + $0x1c8] sm:$0xff] %v580_v57  ;;  %v586_v60 = vld [vmem:[%s3356_s26 + $0x2e0] sm:$0xff] }
  0x2f   : > { %583 = vst [vmem:[%s3361_s27 + $0x1d0] sm:$0xff] %v582_v58  ;;  %585 = vst [vmem:[%s3361_s27 + $0x1d8] sm:$0xff] %v584_v59  ;;  %v588_v61 = vld [vmem:[%s3356_s26 + $0x2e8] sm:$0xff]  ;;  %v590_v62 = vld [vmem:[%s3356_s26 + $0x2f0] sm:$0xff] }
  0x30   : > { %587 = vst [vmem:[%s3361_s27 + $0x1e0] sm:$0xff] %v586_v60  ;;  %589 = vst [vmem:[%s3361_s27 + $0x1e8] sm:$0xff] %v588_v61  ;;  %v592_v63 = vld [vmem:[%s3356_s26 + $0x2f8] sm:$0xff] }
  0x31   : > { %591 = vst [vmem:[%s3361_s27 + $0x1f0] sm:$0xff] %v590_v62  ;;  %593 = vst [vmem:[%s3361_s27 + $0x1f8] sm:$0xff] %v592_v63 }
  0x32 PF: > { %p2918_p5 = scmp.ge.s32.totalorder %s3263_s15, 1  ;;  %p598_p6 = scmp.lt.s32.totalorder %s3263_s15, 3 }
  0x34   : > { %p599_p7 = pnand %p2918_p5, %p598_p6 }
  0x35   : > { %v736_v0 = vld [vmem:[%s4713_s1] sm:$0xf] (!%p599_p7)  ;;  %vm834_vm0 = vcmask (!%p599_p7), 1043456   ;;  %s605_s30 = sand.u32 (!%p599_p7), 1, %s3255_s13   ;;  %vm680_vm1 = vcmask (!%p599_p7), 64512   ;;  %vm737_vm2 = vcmask (!%p599_p7), 31744  }
  0x36   : > { %602 = sbr.rel (%p599_p7) target bundleno = 801 (0x321), region = 94  ;;  %3104 = vmatprep.subr.msk.mxu0 (!%p599_p7), %vm834_vm0, %v736_v0  ;;  %s3494_s11 = sshll.u32 (!%p599_p7), %s605_s30, 9  ;;  %vm683_vm3 = vcmask (!%p599_p7), 58368   ;;  %v3265_v1 = vmov (!%p599_p7), 0.0   ;;  %v2194_v34 = vld [vmem:[%s4719_s7] sm:$0xff] (!%p599_p7) }
  0x37   : > { %3105 = vmatpush3.msk.msra.mxu0 (!%p599_p7), %vm834_vm0, %v736_v0  ;;  %686 = vst.msk [vmem:[#allocation2 + $0x20] sm:$0xff] (!%p599_p7), %vm680_vm1, %v3265_v1  ;;  %681 = vst.msk [vmem:[#allocation2] sm:$0xff] (!%p599_p7), %vm680_vm1, %v3265_v1  ;;  %s3551_s12 = scalar_lea.vmem (!%p599_p7), [#allocation3], %s3494_s11  ;;  %3154 = vmatprep.subr.mxu1 (!%p599_p7), %v2194_v34  ;;  %v3623_v35 = vld [vmem:[%s4714_s2] ss:$0 sm:$0xff] (!%p599_p7)  ;;  %s3266_s30 = smov (!%p599_p7), 4  }
  0x38   : > { %687 = vst.msk [vmem:[#allocation2 + $0x28] sm:$0x3] (!%p599_p7), %vm683_vm3, %v3265_v1  ;;  %684 = vst.msk [vmem:[#allocation2 + $0x10] sm:$0x3] (!%p599_p7), %vm683_vm3, %v3265_v1  ;;  %v2922_v2 = vld [vmem:[%s3551_s12 + $0x100] sm:$0xff] (!%p599_p7)  ;;  %v2923_v3 = vld [vmem:[%s3551_s12 + $0x108] sm:$0xff] (!%p599_p7)  ;;  %3155 = vmatpush3.msra.mxu1 (!%p599_p7), %v2194_v34 }
  0x39   : > { %682 = vst.msk [vmem:[#allocation2 + $0x8] sm:$0xff] (!%p599_p7), %vm680_vm1, %v3265_v1  ;;  %685 = vst.msk [vmem:[#allocation2 + $0x18] sm:$0xff] (!%p599_p7), %vm680_vm1, %v3265_v1  ;;  %v2924_v4 = vld [vmem:[%s3551_s12 + $0x110] sm:$0xff] (!%p599_p7)  ;;  %3106 = vmatprep.mubr.msk.f32.mxu0 (!%p599_p7), %vm737_vm2, %v2922_v2  ;;  %v2925_v5 = vld [vmem:[%s3551_s12 + $0x118] sm:$0xff] (!%p599_p7)  ;;  %p642_p8 = scmp.lt.s32.totalorder (!%p599_p7), %s2911_s16, 1 }
  0x3a   : > { %688 = vst.msk [vmem:[#allocation2 + $0x30] sm:$0xff] (!%p599_p7), %vm680_vm1, %v3265_v1  ;;  %689 = vst.msk [vmem:[#allocation2 + $0x38] sm:$0xff] (!%p599_p7), %vm680_vm1, %v3265_v1  ;;  %3107 = vmatmul.mubr.msk.f32.vlgmr.msra.gmra.mrb[0].mxu0 (!%p599_p7), %vm737_vm2, %v2923_v3  ;;  %v2926_v6 = vld [vmem:[%s3551_s12 + $0x120] sm:$0xff] (!%p599_p7)  ;;  %v2927_v7 = vld [vmem:[%s3551_s12 + $0x128] sm:$0xff] (!%p599_p7) }
  0x3b   : > { %690 = vst.msk [vmem:[#allocation2 + $0x40] sm:$0x3] (!%p599_p7), %vm683_vm3, %v3265_v1  ;;  %693 = vst.msk [vmem:[#allocation2 + $0x58] sm:$0x3] (!%p599_p7), %vm683_vm3, %v3265_v1  ;;  %3109 = vmatprep.mubr.msk.f32.mxu0 (!%p599_p7), %vm737_vm2, %v2924_v4  ;;  %v2928_v8 = vld [vmem:[%s3551_s12 + $0x130] sm:$0xff] (!%p599_p7)  ;;  %v2929_v9 = vld [vmem:[%s3551_s12 + $0x138] sm:$0xff] (!%p599_p7) }
  0x3c   : > { %691 = vst.msk [vmem:[#allocation2 + $0x48] sm:$0xff] (!%p599_p7), %vm680_vm1, %v3265_v1  ;;  %692 = vst.msk [vmem:[#allocation2 + $0x50] sm:$0xff] (!%p599_p7), %vm680_vm1, %v3265_v1  ;;  %v2930_v10 = vld [vmem:[%s3551_s12 + $0x140] sm:$0xff] (!%p599_p7)  ;;  %v2931_v11 = vld [vmem:[%s3551_s12 + $0x148] sm:$0xff] (!%p599_p7) }
  0x3d   : > { %694 = vst.msk [vmem:[#allocation2 + $0x60] sm:$0xff] %vm680_vm1, %v3265_v1  ;;  %695 = vst.msk [vmem:[#allocation2 + $0x68] sm:$0xff] %vm680_vm1, %v3265_v1  ;;  %v2932_v12 = vld [vmem:[%s3551_s12 + $0x150] sm:$0xff]  ;;  %v2933_v13 = vld [vmem:[%s3551_s12 + $0x158] sm:$0xff]  ;;  %s4727_s16 = smov (!%p642_p8, %s2911_s16), 1 }
  0x3e   : > { %696 = vst.msk [vmem:[#allocation2 + $0x70] sm:$0x3] %vm683_vm3, %v3265_v1  ;;  %699 = vst.msk [vmem:[#allocation2 + $0x88] sm:$0x3] %vm683_vm3, %v3265_v1  ;;  %3110 = vmatmul.mubr.msk.f32.gmra.mrb[2].mxu0 %vm737_vm2, %v2925_v5  ;;  %v2934_v14 = vld [vmem:[%s3551_s12 + $0x160] sm:$0xff]  ;;  %v2935_v15 = vld [vmem:[%s3551_s12 + $0x168] sm:$0xff] }
  0x3f   : > { %697 = vst.msk [vmem:[#allocation2 + $0x78] sm:$0xff] %vm680_vm1, %v3265_v1  ;;  %698 = vst.msk [vmem:[#allocation2 + $0x80] sm:$0xff] %vm680_vm1, %v3265_v1  ;;  %3112 = vmatprep.mubr.msk.f32.mxu0 %vm737_vm2, %v2926_v6  ;;  %v2936_v16 = vld [vmem:[%s3551_s12 + $0x170] sm:$0xff]  ;;  %v2937_v17 = vld [vmem:[%s3551_s12 + $0x178] sm:$0xff]  ;;  %s3037_s11 = sshll.u32 %s4727_s16, 8 }
  0x40   : > { %700 = vst.msk [vmem:[#allocation2 + $0x90] sm:$0xff] %vm680_vm1, %v3265_v1  ;;  %701 = vst.msk [vmem:[#allocation2 + $0x98] sm:$0xff] %vm680_vm1, %v3265_v1  ;;  %v2938_v18 = vld [vmem:[%s3551_s12 + $0x180] sm:$0xff]  ;;  %v2939_v19 = vld [vmem:[%s3551_s12 + $0x188] sm:$0xff]  ;;  %s4541_s15 = scalar_lea.vmem %s4722_s10, %s3037_s11 }
  0x41   : > { %702 = vst.msk [vmem:[#allocation2 + $0xa0] sm:$0x3] %vm683_vm3, %v3265_v1  ;;  %705 = vst.msk [vmem:[#allocation2 + $0xb8] sm:$0x3] %vm683_vm3, %v3265_v1  ;;  %v2940_v20 = vld [vmem:[%s3551_s12 + $0x190] sm:$0xff]  ;;  %v2941_v21 = vld [vmem:[%s3551_s12 + $0x198] sm:$0xff] }
  0x42   : > { %703 = vst.msk [vmem:[#allocation2 + $0xa8] sm:$0xff] %vm680_vm1, %v3265_v1  ;;  %704 = vst.msk [vmem:[#allocation2 + $0xb0] sm:$0xff] %vm680_vm1, %v3265_v1  ;;  %3113 = vmatmul.mubr.msk.f32.gmra.mrb[4].mxu0 %vm737_vm2, %v2927_v7  ;;  %v2942_v22 = vld [vmem:[%s3551_s12 + $0x1a0] sm:$0xff]  ;;  %v2943_v23 = vld [vmem:[%s3551_s12 + $0x1a8] sm:$0xff] }
  0x43   : > { %706 = vst.msk [vmem:[#allocation2 + $0xc0] sm:$0xff] %vm680_vm1, %v3265_v1  ;;  %707 = vst.msk [vmem:[#allocation2 + $0xc8] sm:$0xff] %vm680_vm1, %v3265_v1  ;;  %3115 = vmatprep.mubr.msk.f32.mxu0 %vm737_vm2, %v2928_v8  ;;  %v2944_v24 = vld [vmem:[%s3551_s12 + $0x1b0] sm:$0xff]  ;;  %v2945_v25 = vld [vmem:[%s3551_s12 + $0x1b8] sm:$0xff] }
  0x44   : > { %708 = vst.msk [vmem:[#allocation2 + $0xd0] sm:$0x3] %vm683_vm3, %v3265_v1  ;;  %711 = vst.msk [vmem:[#allocation2 + $0xe8] sm:$0x3] %vm683_vm3, %v3265_v1  ;;  %v2946_v26 = vld [vmem:[%s3551_s12 + $0x1c0] sm:$0xff]  ;;  %v2947_v27 = vld [vmem:[%s3551_s12 + $0x1c8] sm:$0xff] }
  0x45   : > { %709 = vst.msk [vmem:[#allocation2 + $0xd8] sm:$0xff] %vm680_vm1, %v3265_v1  ;;  %710 = vst.msk [vmem:[#allocation2 + $0xe0] sm:$0xff] %vm680_vm1, %v3265_v1  ;;  %v2948_v28 = vld [vmem:[%s3551_s12 + $0x1d0] sm:$0xff]  ;;  %v2949_v29 = vld [vmem:[%s3551_s12 + $0x1d8] sm:$0xff] }
  0x46   : > { %712 = vst.msk [vmem:[#allocation2 + $0xf0] sm:$0xff] %vm680_vm1, %v3265_v1  ;;  %713 = vst.msk [vmem:[#allocation2 + $0xf8] sm:$0xff] %vm680_vm1, %v3265_v1  ;;  %3116 = vmatmul.mubr.msk.f32.gmra.mrb[6].mxu0 %vm737_vm2, %v2929_v9  ;;  %v2950_v30 = vld [vmem:[%s3551_s12 + $0x1e0] sm:$0xff]  ;;  %v2951_v31 = vld [vmem:[%s3551_s12 + $0x1e8] sm:$0xff] }
  0x47   : > { %714 = vst.msk [vmem:[#allocation2 + $0x100] sm:$0x3] %vm683_vm3, %v3265_v1  ;;  %717 = vst.msk [vmem:[#allocation2 + $0x118] sm:$0x3] %vm683_vm3, %v3265_v1  ;;  %3118 = vmatprep.mubr.msk.f32.mxu0 %vm737_vm2, %v2930_v10  ;;  %v2952_v32 = vld [vmem:[%s3551_s12 + $0x1f0] sm:$0xff]  ;;  %v2953_v33 = vld [vmem:[%s3551_s12 + $0x1f8] sm:$0xff] }
  0x48   : > { %715 = vst.msk [vmem:[#allocation2 + $0x108] sm:$0xff] %vm680_vm1, %v3265_v1  ;;  %716 = vst.msk [vmem:[#allocation2 + $0x110] sm:$0xff] %vm680_vm1, %v3265_v1  ;;  %v3628_v37 = vld [vmem:[%s4715_s3] ss:$0 sm:$0xff]  ;;  %v1307_v44 = vld [vmem:[#allocation2 + $0x1] sm:$0xff] }
  0x49   : > { %718 = vst.msk [vmem:[#allocation2 + $0x120] sm:$0xff] %vm680_vm1, %v3265_v1  ;;  %719 = vst.msk [vmem:[#allocation2 + $0x128] sm:$0xff] %vm680_vm1, %v3265_v1  ;;  %v1206_v41 = vld [vmem:[#allocation2] sm:$0xff]  ;;  %v1207_v48 = vld [vmem:[#allocation2 + $0x8] sm:$0xff] }
  0x4a   : > { %720 = vst.msk [vmem:[#allocation2 + $0x130] sm:$0x3] %vm683_vm3, %v3265_v1  ;;  %723 = vst.msk [vmem:[#allocation2 + $0x148] sm:$0x3] %vm683_vm3, %v3265_v1  ;;  %3119 = vmatmul.mubr.msk.f32.gmra.mrb[8].mxu0 %vm737_vm2, %v2931_v11  ;;  %v3636_v43 = vld [vmem:[%s4716_s4] ss:$0 sm:$0xff] }
  0x4b   : > { %721 = vst.msk [vmem:[#allocation2 + $0x138] sm:$0xff] %vm680_vm1, %v3265_v1  ;;  %722 = vst.msk [vmem:[#allocation2 + $0x140] sm:$0xff] %vm680_vm1, %v3265_v1  ;;  %3121 = vmatprep.mubr.msk.f32.mxu0 %vm737_vm2, %v2932_v12  ;;  %v3641_v45 = vld [vmem:[%s4716_s4 + $0x1] ss:$0 sm:$0xff]  ;;  %v1308_v49 = vld [vmem:[#allocation2 + $0x9] sm:$0xff]  ;;  %v1243_v55 = vmul.f32 %v3636_v43, %v1206_v41  ;;  %v1244_v60 = vmul.f32 %v3636_v43, %v1207_v48 }
  0x4c   : > { %724 = vst.msk [vmem:[#allocation2 + $0x150] sm:$0xff] %vm680_vm1, %v3265_v1  ;;  %725 = vst.msk [vmem:[#allocation2 + $0x158] sm:$0xff] %vm680_vm1, %v3265_v1  ;;  %v1344_v56 = vmul.f32 %v3641_v45, %v1307_v44  ;;  %v1408_v58 = vld [vmem:[#allocation2 + $0x2] sm:$0xff]  ;;  %v1345_v61 = vmul.f32 %v3641_v45, %v1308_v49  ;;  %v1409_v0 = vld [vmem:[#allocation2 + $0xa] sm:$0xff] }
  0x4d   : > { %726 = vst.msk [vmem:[#allocation2 + $0x160] sm:$0x3] %vm683_vm3, %v3265_v1  ;;  %729 = vst.msk [vmem:[#allocation2 + $0x178] sm:$0x3] %vm683_vm3, %v3265_v1  ;;  %v3653_v59 = vld [vmem:[%s4716_s4 + $0x2] ss:$0 sm:$0xff] }
  0x4e   : > { %727 = vst.msk [vmem:[#allocation2 + $0x168] sm:$0xff] %vm680_vm1, %v3265_v1  ;;  %728 = vst.msk [vmem:[#allocation2 + $0x170] sm:$0xff] %vm680_vm1, %v3265_v1  ;;  %3122 = vmatmul.mubr.msk.f32.gmra.mrb[10].mxu0 %vm737_vm2, %v2933_v13  ;;  %v1376_v6 = vadd.f32 %v1344_v56, %v1243_v55  ;;  %v1445_v7 = vmul.f32 %v3653_v59, %v1408_v58  ;;  %v1377_v9 = vadd.f32 %v1345_v61, %v1244_v60  ;;  %v3670_v13 = vld [vmem:[%s4716_s4 + $0x4] ss:$0 sm:$0xff] }
  0x4f   : > { %730 = vst.msk [vmem:[#allocation2 + $0x180] sm:$0xff] %vm680_vm1, %v3265_v1  ;;  %731 = vst.msk [vmem:[#allocation2 + $0x188] sm:$0xff] %vm680_vm1, %v3265_v1  ;;  %3124 = vmatprep.mubr.msk.f32.mxu0 %vm737_vm2, %v2934_v14  ;;  %v1446_v10 = vmul.f32 %v3653_v59, %v1409_v0  ;;  %v3675_v14 = vld [vmem:[%s4716_s4 + $0x5] ss:$0 sm:$0xff] }
  0x50   : > { %732 = vst.msk [vmem:[#allocation2 + $0x190] sm:$0x3] %vm683_vm3, %v3265_v1  ;;  %735 = vst.msk [vmem:[#allocation2 + $0x1a8] sm:$0x3] %vm683_vm3, %v3265_v1 }
  0x51   : > { %733 = vst.msk [vmem:[#allocation2 + $0x198] sm:$0xff] %vm680_vm1, %v3265_v1  ;;  %734 = vst.msk [vmem:[#allocation2 + $0x1a0] sm:$0xff] %vm680_vm1, %v3265_v1 }
  0x52   : > { %3125 = vmatmul.mubr.msk.f32.gmra.mrb[12].mxu0 %vm737_vm2, %v2935_v15 }
  0x53   : > { %3127 = vmatprep.mubr.msk.f32.mxu0 %vm737_vm2, %v2936_v16 }
  0x56   : > { %3128 = vmatmul.mubr.msk.f32.gmra.mrb[14].mxu0 %vm737_vm2, %v2937_v17 }
  0x57   : > { %3130 = vmatprep.mubr.msk.f32.mxu0 %vm737_vm2, %v2938_v18  ;;  %v3681_v18 = vld [vmem:[%s4716_s4 + $0x3] ss:$0 sm:$0xff] }
  0x5a   : > { %3131 = vmatmul.mubr.msk.f32.gmra.mrb[16].mxu0 %vm737_vm2, %v2939_v19 }
  0x5b   : > { %3133 = vmatprep.mubr.msk.f32.mxu0 %vm737_vm2, %v2940_v20 }
  0x5e   : > { %3134 = vmatmul.mubr.msk.f32.gmra.mrb[18].mxu0 %vm737_vm2, %v2941_v21  ;;  %v1477_v21 = vadd.f32 %v1445_v7, %v1376_v6 }
  0x5f   : > { %3136 = vmatprep.mubr.msk.f32.mxu0 %vm737_vm2, %v2942_v22 }
  0x62   : > { %3137 = vmatmul.mubr.msk.f32.gmra.mrb[20].mxu0 %vm737_vm2, %v2943_v23 }
  0x63   : > { %3139 = vmatprep.mubr.msk.f32.mxu0 %vm737_vm2, %v2944_v24 }
  0x66   : > { %3140 = vmatmul.mubr.msk.f32.gmra.mrb[22].mxu0 %vm737_vm2, %v2945_v25 }
  0x67   : > { %3142 = vmatprep.mubr.msk.f32.mxu0 %vm737_vm2, %v2946_v26 }
  0x6a   : > { %3143 = vmatmul.mubr.msk.f32.gmra.mrb[24].mxu0 %vm737_vm2, %v2947_v27 }
  0x6b   : > { %3145 = vmatprep.mubr.msk.f32.mxu0 %vm737_vm2, %v2948_v28  ;;  %v1478_v28 = vadd.f32 %v1446_v10, %v1377_v9 }
  0x6e   : > { %3146 = vmatmul.mubr.msk.f32.gmra.mrb[26].mxu0 %vm737_vm2, %v2949_v29 }
  0x6f   : > { %3148 = vmatprep.mubr.msk.f32.mxu0 %vm737_vm2, %v2950_v30 }
  0x72   : > { %3149 = vmatmul.mubr.msk.f32.gmra.mrb[28].mxu0 %vm737_vm2, %v2951_v31 }
  0x73   : > { %3151 = vmatprep.mubr.msk.f32.mxu0 %vm737_vm2, %v2952_v32 }
  0x76   : > { %3152 = vmatmul.mubr.msk.f32.gmra.mrb[30].mxu0 %vm737_vm2, %v2953_v33 }
 0x10d   : > { %v3108_v36 = vpop.f32.mrb[0].mxu0 }
 0x10e   : > { %v1071_v38 = vmul.f32 %v3108_v36, %v3623_v35  ;;  %v904_v39 = vpop.f32.mrb[1].mxu0  ;;  %v3698_v36 = vld [vmem:[%s4716_s4 + $0x7] ss:$0 sm:$0xff] }
 0x10f   : > { %v1070_v40 = vmul.f32 %v3623_v35, %v904_v39 }
 0x110   : > { %v1110_v42 = vadd.f32 %v3628_v37, %v1071_v38 }
 0x111   : > { %v1109_v46 = vadd.f32 %v3628_v37, %v1070_v40  ;;  %v3111_v47 = vpop.f32.mrb[2].mxu0 }
 0x112   : > { %v1142_v50 = vmax.f32 %v1110_v42, 0.0  ;;  %v1073_v51 = vmul.f32 %v3111_v47, %v3623_v35  ;;  %v914_v52 = vpop.f32.mrb[3].mxu0  ;;  %v3715_v47 = vld [vmem:[%s4716_s4 + $0x8] ss:$0 sm:$0xff] }
 0x113   : > { %v1141_v53 = vmax.f32 %v1109_v46, 0.0  ;;  %v1072_v54 = vmul.f32 %v3623_v35, %v914_v52  ;;  %v3710_v46 = vld [vmem:[%s4716_s4 + $0x6] ss:$0 sm:$0xff] }
 0x114   : > { %1175 = vst.msk [vmem:[#allocation2 + $0x21] sm:$0xff] %vm680_vm1, %v1142_v50  ;;  %v1112_v57 = vadd.f32 %v3628_v37, %v1073_v51 }
 0x115   : > { %1174 = vst.msk [vmem:[#allocation2 + $0x19] sm:$0xff] %vm680_vm1, %v1141_v53  ;;  %v1111_v62 = vadd.f32 %v3628_v37, %v1072_v54  ;;  %v3114_v63 = vpop.f32.mrb[4].mxu0 }
 0x116   : > { %v1144_v1 = vmax.f32 %v1112_v57, 0.0  ;;  %v1075_v2 = vmul.f32 %v3114_v63, %v3623_v35  ;;  %v924_v3 = vpop.f32.mrb[5].mxu0 }
 0x117   : > { %v1143_v4 = vmax.f32 %v1111_v62, 0.0  ;;  %v1074_v5 = vmul.f32 %v3623_v35, %v924_v3 }
 0x118   : > { %1177 = vst.msk [vmem:[#allocation2 + $0x39] sm:$0xff] %vm680_vm1, %v1144_v1  ;;  %v1114_v8 = vadd.f32 %v3628_v37, %v1075_v2 }
 0x119   : > { %1176 = vst.msk [vmem:[#allocation2 + $0x31] sm:$0xff] %vm680_vm1, %v1143_v4  ;;  %v1113_v11 = vadd.f32 %v3628_v37, %v1074_v5  ;;  %v3117_v12 = vpop.f32.mrb[6].mxu0 }
 0x11a   : > { %v1146_v15 = vmax.f32 %v1114_v8, 0.0  ;;  %v1077_v16 = vmul.f32 %v3117_v12, %v3623_v35  ;;  %v934_v17 = vpop.f32.mrb[7].mxu0 }
 0x11b   : > { %v1145_v19 = vmax.f32 %v1113_v11, 0.0  ;;  %v1076_v20 = vmul.f32 %v3623_v35, %v934_v17  ;;  %v1611_v22 = vld [vmem:[#allocation2 + $0x21] sm:$0xff] }
 0x11c   : > { %v3684_v23 = vld [vmem:[#allocation2 + $0x22] sm:$0xff]  ;;  %1179 = vst.msk [vmem:[#allocation2 + $0x51] sm:$0xff] %vm680_vm1, %v1146_v15  ;;  %v1116_v24 = vadd.f32 %v3628_v37, %v1077_v16  ;;  %v1509_v25 = vld [vmem:[#allocation2 + $0x18] sm:$0xff]  ;;  %v1648_v29 = vmul.f32 %v3670_v13, %v1611_v22  ;;  %v3703_v39 = vmul.f32 %v3641_v45, %v1611_v22 }
 0x11d   : > { %v1610_v26 = vld [vmem:[#allocation2 + $0x19] sm:$0xff]  ;;  %v1749_v30 = vmul.f32 %v3675_v14, %v3684_v23  ;;  %1178 = vst.msk [vmem:[#allocation2 + $0x49] sm:$0xff] %vm680_vm1, %v1145_v19  ;;  %v1115_v31 = vadd.f32 %v3628_v37, %v1076_v20  ;;  %v3120_v32 = vpop.f32.mrb[8].mxu0  ;;  %v1546_v33 = vmul.f32 %v3681_v18, %v1509_v25  ;;  %v1245_v54 = vmul.f32 %v3636_v43, %v1509_v25 }
 0x11e   : > { %v1711_v27 = vld [vmem:[#allocation2 + $0x1a] sm:$0xff]  ;;  %v1647_v34 = vmul.f32 %v3670_v13, %v1610_v26  ;;  %v1148_v40 = vmax.f32 %v1116_v24, 0.0  ;;  %v1079_v41 = vmul.f32 %v3120_v32, %v3623_v35  ;;  %v944_v42 = vpop.f32.mrb[9].mxu0  ;;  %v1346_v61 = vmul.f32 %v3641_v45, %v1610_v26 }
 0x11f   : > { %v3700_v38 = vld [vmem:[#allocation2 + $0x20] sm:$0xff]  ;;  %v1748_v44 = vmul.f32 %v3675_v14, %v1711_v27  ;;  %v1147_v49 = vmax.f32 %v1115_v31, 0.0  ;;  %v1078_v50 = vmul.f32 %v3623_v35, %v944_v42  ;;  %v1578_v51 = vadd.f32 %v1546_v33, %v1477_v21 }
 0x120   : > { %v1547_v48 = vmul.f32 %v3681_v18, %v3700_v38  ;;  %v3720_v52 = vld [vmem:[#allocation2 + $0x39] sm:$0xff]  ;;  %1181 = vst.msk [vmem:[#allocation2 + $0x69] sm:$0xff] %vm680_vm1, %v1148_v40  ;;  %v1118_v55 = vadd.f32 %v3628_v37, %v1079_v41  ;;  %v3727_v56 = vld [vmem:[#allocation2 + $0x30] sm:$0xff]  ;;  %v1378_v19 = vadd.f32 %v1346_v61, %v1245_v54  ;;  %v1447_v20 = vmul.f32 %v3653_v59, %v1711_v27 }
 0x121   : > { %v3722_v53 = vld [vmem:[#allocation2 + $0x3a] sm:$0xff]  ;;  %v3729_v57 = vld [vmem:[#allocation2 + $0x31] sm:$0xff]  ;;  %v1952_v60 = vmul.f32 %v3698_v36, %v3720_v52  ;;  %1180 = vst.msk [vmem:[#allocation2 + $0x61] sm:$0xff] %vm680_vm1, %v1147_v49  ;;  %v1117_v62 = vadd.f32 %v3628_v37, %v1078_v50  ;;  %v3123_v63 = vpop.f32.mrb[10].mxu0  ;;  %v1679_v0 = vadd.f32 %v1647_v34, %v1578_v51  ;;  %v1850_v1 = vmul.f32 %v3710_v46, %v3727_v56 }
 0x122   : > { %v1579_v58 = vadd.f32 %v1547_v48, %v1478_v28  ;;  %v3738_v2 = vld [vmem:[#allocation2 + $0x38] sm:$0xff]  ;;  %v2053_v3 = vmul.f32 %v3715_v47, %v3722_v53  ;;  %v1150_v4 = vmax.f32 %v1118_v55, 0.0  ;;  %v1081_v5 = vmul.f32 %v3123_v63, %v3623_v35  ;;  %v954_v6 = vpop.f32.mrb[11].mxu0  ;;  %v3772_v48 = vld [vmem:[%s4717_s5] ss:$0 sm:$0xff] }
 0x123   : > { %v1951_v7 = vmul.f32 %v3698_v36, %v3729_v57  ;;  %v3745_v8 = vld [vmem:[#allocation2 + $0x32] sm:$0xff]  ;;  %v1149_v10 = vmax.f32 %v1117_v62, 0.0  ;;  %v1080_v11 = vmul.f32 %v3623_v35, %v954_v6  ;;  %v1780_v12 = vadd.f32 %v1748_v44, %v1679_v0 }
 0x124   : > { %v1680_v9 = vadd.f32 %v1648_v29, %v1579_v58  ;;  %v1851_v15 = vmul.f32 %v3710_v46, %v3738_v2  ;;  %1183 = vst.msk [vmem:[#allocation2 + $0x81] sm:$0xff] %vm680_vm1, %v1150_v4  ;;  %v1120_v16 = vadd.f32 %v3628_v37, %v1081_v5  ;;  %v2052_v25 = vmul.f32 %v3715_v47, %v3745_v8  ;;  %v3760_v33 = vld [vmem:[#allocation2 + $0x48] sm:$0xff] }
 0x125   : > { %1182 = vst.msk [vmem:[#allocation2 + $0x79] sm:$0xff] %vm680_vm1, %v1149_v10  ;;  %v1119_v21 = vadd.f32 %v3628_v37, %v1080_v11  ;;  %v3126_v22 = vpop.f32.mrb[12].mxu0  ;;  %v1882_v24 = vadd.f32 %v1850_v1, %v1780_v12  ;;  %v1548_v26 = vmul.f32 %v3681_v18, %v3727_v56  ;;  %v1479_v32 = vadd.f32 %v1447_v20, %v1378_v19  ;;  %v3762_v27 = vld [vmem:[#allocation2 + $0x49] sm:$0xff]  ;;  %v3786_v1 = vld [vmem:[%s4718_s6] ss:$0 sm:$0xff] }
 0x126   : > { %v1781_v17 = vadd.f32 %v1749_v30, %v1680_v9  ;;  %v1152_v28 = vmax.f32 %v1120_v16, 0.0  ;;  %v1083_v29 = vmul.f32 %v3126_v22, %v3623_v35  ;;  %v964_v31 = vpop.f32.mrb[13].mxu0  ;;  %v1649_v42 = vmul.f32 %v3670_v13, %v3729_v57  ;;  %v3800_v20 = vld [vmem:[#allocation2 + $0x4a] sm:$0xff] }
 0x127   : > { %v1151_v34 = vmax.f32 %v1119_v21, 0.0  ;;  %v1082_v40 = vmul.f32 %v3623_v35, %v964_v31  ;;  %v1983_v41 = vadd.f32 %v1951_v7, %v1882_v24  ;;  %v1580_v50 = vadd.f32 %v1548_v26, %v1479_v32 }
 0x128   : > { %v1883_v30 = vadd.f32 %v1851_v15, %v1781_v17  ;;  %1185 = vst.msk [vmem:[#allocation2 + $0x99] sm:$0xff] %vm680_vm1, %v1152_v28  ;;  %v1122_v44 = vadd.f32 %v3628_v37, %v1083_v29  ;;  %v1750_v51 = vmul.f32 %v3675_v14, %v3745_v8  ;;  %v1852_v61 = vmul.f32 %v3710_v46, %v3760_v33  ;;  %v3807_v28 = vld [vmem:[#allocation2 + $0x50] sm:$0xff] }
 0x129   : > { %1184 = vst.msk [vmem:[#allocation2 + $0x91] sm:$0xff] %vm680_vm1, %v1151_v34  ;;  %v1121_v54 = vadd.f32 %v3628_v37, %v1082_v40  ;;  %v3129_v55 = vpop.f32.mrb[14].mxu0  ;;  %v2084_v58 = vadd.f32 %v2052_v25, %v1983_v41  ;;  %v1953_v62 = vmul.f32 %v3698_v36, %v3762_v27  ;;  %v1681_v5 = vadd.f32 %v1649_v42, %v1580_v50 }
 0x12a   : > { %v1984_v49 = vadd.f32 %v1952_v60, %v1883_v30  ;;  %v1154_v63 = vmax.f32 %v1122_v44, 0.0  ;;  %v1085_v0 = vmul.f32 %v3129_v55, %v3623_v35  ;;  %v974_v60 = vpop.f32.mrb[15].mxu0  ;;  %v1246_v10 = vmul.f32 %v3636_v43, %v3700_v38 }
 0x12b   : > { %v1153_v6 = vmax.f32 %v1121_v54, 0.0  ;;  %v1084_v7 = vmul.f32 %v3623_v35, %v974_v60  ;;  %v2123_v9 = vmul.f32 %v3772_v48, %v2084_v58  ;;  %v1782_v15 = vadd.f32 %v1750_v51, %v1681_v5  ;;  %v3824_v51 = vld [vmem:[#allocation2 + $0x51] sm:$0xff] }
 0x12c   : > { %v2085_v4 = vadd.f32 %v2053_v3, %v1984_v49  ;;  %1187 = vst.msk [vmem:[#allocation2 + $0xb1] sm:$0xff] %vm680_vm1, %v1154_v63  ;;  %v1124_v11 = vadd.f32 %v3628_v37, %v1085_v0  ;;  %v1448_v16 = vmul.f32 %v3653_v59, %v3684_v23  ;;  %v1379_v38 = vadd.f32 %v3703_v39, %v1246_v10 }
 0x12d   : > { %1186 = vst.msk [vmem:[#allocation2 + $0xa9] sm:$0xff] %vm680_vm1, %v1153_v6  ;;  %v1123_v3 = vadd.f32 %v3628_v37, %v1084_v7  ;;  %v3132_v17 = vpop.f32.mrb[16].mxu0  ;;  %v2162_v19 = vadd.f32 %v3786_v1, %v2123_v9  ;;  %v1549_v21 = vmul.f32 %v3681_v18, %v3738_v2  ;;  %v1884_v26 = vadd.f32 %v1852_v61, %v1782_v15 }
 0x12e   : > { %v2124_v12 = vmul.f32 %v3772_v48, %v2085_v4  ;;  %v1156_v22 = vmax.f32 %v1124_v11, 0.0  ;;  %v1087_v24 = vmul.f32 %v3132_v17, %v3623_v35  ;;  %v984_v25 = vpop.f32.mrb[17].mxu0  ;;  %v1480_v30 = vadd.f32 %v1448_v16, %v1379_v38  ;;  %v3841_v11 = vld [vmem:[#allocation2 + $0x52] sm:$0xff] }
 0x12f   : > { %v1155_v29 = vmax.f32 %v1123_v3, 0.0  ;;  %v1086_v31 = vmul.f32 %v3623_v35, %v984_v25  ;;  %3156 = vmatprep.mubr.msk.f32.mxu1 %vm680_vm1, %v2162_v19  ;;  %v1985_v32 = vadd.f32 %v1953_v62, %v1884_v26  ;;  %v2054_v34 = vmul.f32 %v3715_v47, %v3800_v20 }
 0x130   : > { %v2163_v23 = vadd.f32 %v3786_v1, %v2124_v12  ;;  %1189 = vst.msk [vmem:[#allocation2 + $0xc9] sm:$0xff] %vm680_vm1, %v1156_v22  ;;  %v1126_v39 = vadd.f32 %v3628_v37, %v1087_v24  ;;  %v1650_v40 = vmul.f32 %v3670_v13, %v3720_v52  ;;  %v1581_v44 = vadd.f32 %v1549_v21, %v1480_v30 }
 0x131   : > { %1188 = vst.msk [vmem:[#allocation2 + $0xc1] sm:$0xff] %vm680_vm1, %v1155_v29  ;;  %v1125_v41 = vadd.f32 %v3628_v37, %v1086_v31  ;;  %v3135_v42 = vpop.f32.mrb[18].mxu0  ;;  %v1751_v49 = vmul.f32 %v3675_v14, %v3722_v53  ;;  %v1853_v50 = vmul.f32 %v3710_v46, %v3807_v28  ;;  %v2086_v61 = vadd.f32 %v2054_v34, %v1985_v32  ;;  %v3857_v29 = vld [vmem:[#allocation2 + $0x62] sm:$0xff] }
 0x132   : > { %3157 = vmatmul.mubr.msk.f32.vlgmr.msra.gmra.mrb[0].mxu1 %vm680_vm1, %v2163_v23  ;;  %v1158_v54 = vmax.f32 %v1126_v39, 0.0  ;;  %v1089_v55 = vmul.f32 %v3135_v42, %v3623_v35  ;;  %v994_v58 = vpop.f32.mrb[19].mxu0  ;;  %v1247_v62 = vmul.f32 %v3636_v43, %v3727_v56  ;;  %v1682_v60 = vadd.f32 %v1650_v40, %v1581_v44  ;;  %v3861_v32 = vld [vmem:[#allocation2 + $0x60] sm:$0xff] }
 0x133   : > { %v1157_v63 = vmax.f32 %v1125_v41, 0.0  ;;  %v1088_v0 = vmul.f32 %v3623_v35, %v994_v58  ;;  %v1348_v4 = vmul.f32 %v3641_v45, %v3729_v57  ;;  %v2125_v6 = vmul.f32 %v3772_v48, %v2086_v61  ;;  %v3863_v34 = vld [vmem:[#allocation2 + $0x61] sm:$0xff] }
 0x134   : > { %1191 = vst.msk [vmem:[#allocation2 + $0xe1] sm:$0xff] %vm680_vm1, %v1158_v54  ;;  %v1128_v5 = vadd.f32 %v3628_v37, %v1089_v55  ;;  %v1954_v7 = vmul.f32 %v3698_v36, %v3824_v51  ;;  %v1449_v9 = vmul.f32 %v3653_v59, %v3745_v8  ;;  %v1783_v10 = vadd.f32 %v1751_v49, %v1682_v60 }
 0x135   : > { %1190 = vst.msk [vmem:[#allocation2 + $0xd9] sm:$0xff] %vm680_vm1, %v1157_v63  ;;  %v1127_v56 = vadd.f32 %v3628_v37, %v1088_v0  ;;  %v3138_v57 = vpop.f32.mrb[20].mxu0  ;;  %v1380_v12 = vadd.f32 %v1348_v4, %v1247_v62  ;;  %v1550_v15 = vmul.f32 %v3681_v18, %v3760_v33  ;;  %v2164_v3 = vadd.f32 %v3786_v1, %v2125_v6 }
 0x136   : > { %v1160_v16 = vmax.f32 %v1128_v5, 0.0  ;;  %v1091_v17 = vmul.f32 %v3138_v57, %v3623_v35  ;;  %v1004_v19 = vpop.f32.mrb[21].mxu0  ;;  %v1651_v8 = vmul.f32 %v3670_v13, %v3762_v27  ;;  %v1885_v21 = vadd.f32 %v1853_v50, %v1783_v10 }
 0x137   : > { %v1159_v38 = vmax.f32 %v1127_v56, 0.0  ;;  %v1090_v22 = vmul.f32 %v3623_v35, %v1004_v19  ;;  %v1481_v24 = vadd.f32 %v1449_v9, %v1380_v12  ;;  %3159 = vmatprep.mubr.msk.f32.mxu1 %vm680_vm1, %v2164_v3  ;;  %v2055_v25 = vmul.f32 %v3715_v47, %v3841_v11  ;;  %v3896_v19 = vld [vmem:[#allocation2 + $0x68] sm:$0xff] }
 0x138   : > { %1193 = vst.msk [vmem:[#allocation2 + $0xf9] sm:$0xff] %vm680_vm1, %v1160_v16  ;;  %v1130_v23 = vadd.f32 %v3628_v37, %v1091_v17  ;;  %v1752_v26 = vmul.f32 %v3675_v14, %v3800_v20  ;;  %v1986_v31 = vadd.f32 %v1954_v7, %v1885_v21  ;;  %v1248_v40 = vmul.f32 %v3636_v43, %v3738_v2 }
 0x139   : > { %1192 = vst.msk [vmem:[#allocation2 + $0xf1] sm:$0xff] %vm680_vm1, %v1159_v38  ;;  %v1129_v30 = vadd.f32 %v3628_v37, %v1090_v22  ;;  %v1582_v39 = vadd.f32 %v1550_v15, %v1481_v24  ;;  %v3141_v41 = vpop.f32.mrb[22].mxu0  ;;  %v1854_v44 = vmul.f32 %v3710_v46, %v3861_v32  ;;  %v1955_v49 = vmul.f32 %v3698_v36, %v3863_v34  ;;  %v3900_v38 = vld [vmem:[#allocation2 + $0x6a] sm:$0xff] }
 0x13a   : > { %v1162_v42 = vmax.f32 %v1130_v23, 0.0  ;;  %v1349_v50 = vmul.f32 %v3641_v45, %v3720_v52  ;;  %v1014_v54 = vpop.f32.mrb[23].mxu0  ;;  %v2087_v55 = vadd.f32 %v2055_v25, %v1986_v31  ;;  %v2056_v62 = vmul.f32 %v3715_v47, %v3857_v29 }
 0x13b   : > { %v1161_v58 = vmax.f32 %v1129_v30, 0.0  ;;  %v1683_v61 = vadd.f32 %v1651_v8, %v1582_v39  ;;  %v1450_v63 = vmul.f32 %v3653_v59, %v3722_v53  ;;  %v1551_v0 = vmul.f32 %v3681_v18, %v3807_v28  ;;  %v3898_v8 = vld [vmem:[#allocation2 + $0x69] sm:$0xff] }
 0x13c   : > { %1195 = vst.msk [vmem:[#allocation2 + $0x111] sm:$0xff] %vm680_vm1, %v1162_v42  ;;  %v1381_v2 = vadd.f32 %v1349_v50, %v1248_v40  ;;  %v1652_v60 = vmul.f32 %v3670_v13, %v3824_v51  ;;  %v2126_v52 = vmul.f32 %v3772_v48, %v2087_v55  ;;  %v1753_v5 = vmul.f32 %v3675_v14, %v3841_v11  ;;  %v3914_v40 = vld [vmem:[#allocation2 + $0x7a] sm:$0xff] }
 0x13d   : > { %1194 = vst.msk [vmem:[#allocation2 + $0x109] sm:$0xff] %vm680_vm1, %v1161_v58  ;;  %v1784_v4 = vadd.f32 %v1752_v26, %v1683_v61  ;;  %v1093_v6 = vmul.f32 %v3141_v41, %v3623_v35  ;;  %v3144_v7 = vpop.f32.mrb[24].mxu0  ;;  %v1092_v53 = vmul.f32 %v3623_v35, %v1014_v54  ;;  %v1249_v56 = vmul.f32 %v3636_v43, %v3760_v33  ;;  %v3926_v58 = vld [vmem:[#allocation2 + $0x78] sm:$0xff] }
 0x13e   : > { %v1482_v9 = vadd.f32 %v1450_v63, %v1381_v2  ;;  %v1350_v10 = vmul.f32 %v3641_v45, %v3762_v27  ;;  %v1024_v57 = vpop.f32.mrb[25].mxu0  ;;  %v2165_v12 = vadd.f32 %v3786_v1, %v2126_v52  ;;  %v1451_v3 = vmul.f32 %v3653_v59, %v3800_v20  ;;  %v3928_v61 = vld [vmem:[#allocation2 + $0x79] sm:$0xff] }
 0x13f   : > { %v1886_v15 = vadd.f32 %v1854_v44, %v1784_v4  ;;  %v1132_v16 = vadd.f32 %v3628_v37, %v1093_v6  ;;  %v1131_v33 = vadd.f32 %v3628_v37, %v1092_v53  ;;  %v1552_v27 = vmul.f32 %v3681_v18, %v3861_v32 }
 0x140   : > { %v1583_v17 = vadd.f32 %v1551_v0, %v1482_v9  ;;  %v1382_v21 = vadd.f32 %v1350_v10, %v1249_v56  ;;  %3160 = vmatmul.mubr.msk.f32.gmra.mrb[2].mxu1 %vm680_vm1, %v2165_v12  ;;  %v1855_v24 = vmul.f32 %v3710_v46, %v3896_v19  ;;  %v1956_v20 = vmul.f32 %v3698_v36, %v3898_v8 }
 0x141   : > { %v1987_v22 = vadd.f32 %v1955_v49, %v1886_v15  ;;  %v1164_v25 = vmax.f32 %v1132_v16, 0.0  ;;  %v3910_v23 = vpop.f32.mrb[26].mxu0  ;;  %v1163_v31 = vmax.f32 %v1131_v33, 0.0  ;;  %v1653_v39 = vmul.f32 %v3670_v13, %v3863_v34 }
 0x142   : > { %v1684_v26 = vadd.f32 %v1652_v60, %v1583_v17  ;;  %v1483_v30 = vadd.f32 %v1451_v3, %v1382_v21  ;;  %v3916_v41 = vpop.f32.mrb[27].mxu0  ;;  %v2057_v44 = vmul.f32 %v3715_v47, %v3900_v38  ;;  %v1754_v49 = vmul.f32 %v3675_v14, %v3857_v29 }
 0x143   : > { %v2088_v42 = vadd.f32 %v2056_v62, %v1987_v22  ;;  %1197 = vst.msk [vmem:[#allocation2 + $0x129] sm:$0xff] %vm680_vm1, %v1164_v25  ;;  %v1250_v50 = vmul.f32 %v3636_v43, %v3807_v28  ;;  %1196 = vst.msk [vmem:[#allocation2 + $0x121] sm:$0xff] %vm680_vm1, %v1163_v31  ;;  %v1351_v62 = vmul.f32 %v3641_v45, %v3824_v51  ;;  %v3964_v25 = vld [vmem:[#allocation2 + $0x80] sm:$0xff] }
 0x144   : > { %v1785_v54 = vadd.f32 %v1753_v5, %v1684_v26  ;;  %v1584_v55 = vadd.f32 %v1552_v27, %v1483_v30  ;;  %v1452_v2 = vmul.f32 %v3653_v59, %v3841_v11  ;;  %v1856_v0 = vmul.f32 %v3710_v46, %v3926_v58 }
 0x145   : > { %v2127_v63 = vmul.f32 %v3772_v48, %v2088_v42  ;;  %v1957_v28 = vmul.f32 %v3698_v36, %v3928_v61  ;;  %v2058_v60 = vmul.f32 %v3715_v47, %v3914_v40  ;;  %v3941_v52 = vpop.f32.mrb[28].mxu0  ;;  %v1383_v6 = vadd.f32 %v1351_v62, %v1250_v50 }
 0x146   : > { %v1887_v4 = vadd.f32 %v1855_v24, %v1785_v54  ;;  %v1685_v5 = vadd.f32 %v1653_v39, %v1584_v55  ;;  %v1553_v51 = vmul.f32 %v3681_v18, %v3896_v19  ;;  %v3945_v11 = vpop.f32.mrb[29].mxu0  ;;  %v1654_v53 = vmul.f32 %v3670_v13, %v3898_v8 }
 0x147   : > { %v2166_v9 = vadd.f32 %v3786_v1, %v2127_v63  ;;  %v1755_v56 = vmul.f32 %v3675_v14, %v3900_v38  ;;  %v1095_v10 = vmul.f32 %v3144_v7, %v3623_v35  ;;  %v1484_v16 = vadd.f32 %v1452_v2, %v1383_v6 }
 0x148   : > { %v1988_v12 = vadd.f32 %v1956_v20, %v1887_v4  ;;  %v1786_v15 = vadd.f32 %v1754_v49, %v1685_v5  ;;  %v1094_v3 = vmul.f32 %v3623_v35, %v1024_v57  ;;  %v1251_v33 = vmul.f32 %v3636_v43, %v3861_v32  ;;  %v3966_v57 = vld [vmem:[#allocation2 + $0x82] sm:$0xff]  ;;  %v3989_v5 = vld [vmem:[#allocation2 + $0x92] sm:$0xff] }
 0x149   : > { %3162 = vmatprep.mubr.msk.f32.mxu1 %vm680_vm1, %v2166_v9  ;;  %v1134_v17 = vadd.f32 %v3628_v37, %v1095_v10  ;;  %v1352_v21 = vmul.f32 %v3641_v45, %v3863_v34  ;;  %v1453_v27 = vmul.f32 %v3653_v59, %v3857_v29  ;;  %v3962_v22 = vpop.f32.mrb[30].mxu0  ;;  %v1585_v20 = vadd.f32 %v1553_v51, %v1484_v16  ;;  %v3976_v49 = vld [vmem:[#allocation2 + $0x81] sm:$0xff]  ;;  %v3991_v51 = vld [vmem:[#allocation2 + $0x90] sm:$0xff] }
 0x14a   : > { %v2089_v7 = vadd.f32 %v2057_v44, %v1988_v12  ;;  %v1888_v24 = vadd.f32 %v1856_v0, %v1786_v15  ;;  %v1133_v26 = vadd.f32 %v3628_v37, %v1094_v3  ;;  %v3969_v31 = vpop.f32.mrb[31].mxu0  ;;  %v1857_v32 = vmul.f32 %v3710_v46, %v3964_v25  ;;  %v3993_v9 = vld [vmem:[#allocation2 + $0x91] sm:$0xff] }
 0x14b   : > { %v1166_v34 = vmax.f32 %v1134_v17, 0.0  ;;  %v1384_v30 = vadd.f32 %v1352_v21, %v1251_v33  ;;  %v1554_v29 = vmul.f32 %v3681_v18, %v3926_v58  ;;  %v1686_v44 = vadd.f32 %v1654_v53, %v1585_v20 }
 0x14c   : > { %v2128_v39 = vmul.f32 %v3772_v48, %v2089_v7  ;;  %v1989_v42 = vadd.f32 %v1957_v28, %v1888_v24  ;;  %v1165_v50 = vmax.f32 %v1133_v26, 0.0  ;;  %v1958_v54 = vmul.f32 %v3698_v36, %v3976_v49 }
 0x14d   : > { %v2059_v55 = vmul.f32 %v3715_v47, %v3966_v57  ;;  %1199 = vst.msk [vmem:[#allocation2 + $0x141] sm:$0xff] %vm680_vm1, %v1166_v34  ;;  %v1485_v62 = vadd.f32 %v1453_v27, %v1384_v30  ;;  %v1655_v2 = vmul.f32 %v3670_v13, %v3928_v61  ;;  %v1787_v28 = vadd.f32 %v1755_v56, %v1686_v44  ;;  %v4027_v44 = vld [vmem:[#allocation2 + $0x98] sm:$0xff] }
 0x14e   : > { %v2167_v63 = vadd.f32 %v3786_v1, %v2128_v39  ;;  %v2090_v0 = vadd.f32 %v2058_v60, %v1989_v42  ;;  %1198 = vst.msk [vmem:[#allocation2 + $0x139] sm:$0xff] %vm680_vm1, %v1165_v50  ;;  %v1756_v4 = vmul.f32 %v3675_v14, %v3914_v40  ;;  %v1252_v53 = vmul.f32 %v3636_v43, %v3896_v19 }
 0x14f   : > { %v1586_v6 = vadd.f32 %v1554_v29, %v1485_v62  ;;  %v1353_v10 = vmul.f32 %v3641_v45, %v3898_v8  ;;  %v1454_v60 = vmul.f32 %v3653_v59, %v3900_v38  ;;  %v1889_v12 = vadd.f32 %v1857_v32, %v1787_v28 }
 0x150   : > { %3163 = vmatmul.mubr.msk.f32.gmra.mrb[4].mxu1 %vm680_vm1, %v2167_v63  ;;  %v2129_v56 = vmul.f32 %v3772_v48, %v2090_v0  ;;  %v1858_v15 = vmul.f32 %v3710_v46, %v3991_v51  ;;  %v1959_v16 = vmul.f32 %v3698_v36, %v3993_v9  ;;  %v2060_v19 = vmul.f32 %v3715_v47, %v3989_v5 }
 0x151   : > { %v1687_v3 = vadd.f32 %v1655_v2, %v1586_v6  ;;  %v1385_v17 = vadd.f32 %v1353_v10, %v1252_v53  ;;  %v1555_v8 = vmul.f32 %v3681_v18, %v3964_v25  ;;  %v1990_v33 = vadd.f32 %v1958_v54, %v1889_v12  ;;  %v4038_v2 = vld [vmem:[#allocation2 + $0x99] sm:$0xff] }
 0x152   : > { %v2168_v38 = vadd.f32 %v3786_v1, %v2129_v56  ;;  %v1656_v21 = vmul.f32 %v3670_v13, %v3976_v49  ;;  %v1757_v27 = vmul.f32 %v3675_v14, %v3966_v57  ;;  %v1097_v20 = vmul.f32 %v3910_v23, %v3623_v35 }
 0x153   : > { %v1788_v7 = vadd.f32 %v1756_v4, %v1687_v3  ;;  %v1486_v24 = vadd.f32 %v1454_v60, %v1385_v17  ;;  %v1096_v26 = vmul.f32 %v3623_v35, %v3916_v41  ;;  %v2091_v32 = vadd.f32 %v2059_v55, %v1990_v33  ;;  %v4054_v3 = vld [vmem:[#allocation2 + $0xa8] sm:$0xff] }
 0x154   : > { %3165 = vmatprep.mubr.msk.f32.mxu1 %vm680_vm1, %v2168_v38  ;;  %v1253_v34 = vmul.f32 %v3636_v43, %v3926_v58  ;;  %v1354_v30 = vmul.f32 %v3641_v45, %v3928_v61  ;;  %v1455_v29 = vmul.f32 %v3653_v59, %v3914_v40  ;;  %v1136_v23 = vadd.f32 %v3628_v37, %v1097_v20  ;;  %v4034_v58 = vld [vmem:[#allocation2 + $0x9a] sm:$0xff]  ;;  %v4056_v17 = vld [vmem:[#allocation2 + $0xa9] sm:$0xff] }
 0x155   : > { %v1890_v39 = vadd.f32 %v1858_v15, %v1788_v7  ;;  %v1587_v42 = vadd.f32 %v1555_v8, %v1486_v24  ;;  %v1135_v41 = vadd.f32 %v3628_v37, %v1096_v26  ;;  %v2130_v50 = vmul.f32 %v3772_v48, %v2091_v32  ;;  %v4051_v15 = vld [vmem:[#allocation2 + $0xaa] sm:$0xff] }
 0x156   : > { %v1859_v54 = vmul.f32 %v3710_v46, %v4027_v44  ;;  %v1386_v55 = vadd.f32 %v1354_v30, %v1253_v34  ;;  %v1556_v61 = vmul.f32 %v3681_v18, %v3991_v51  ;;  %v1168_v63 = vmax.f32 %v1136_v23, 0.0 }
 0x157   : > { %v1991_v40 = vadd.f32 %v1959_v16, %v1890_v39  ;;  %v1688_v62 = vadd.f32 %v1656_v21, %v1587_v42  ;;  %v1167_v0 = vmax.f32 %v1135_v41, 0.0  ;;  %v2169_v28 = vadd.f32 %v3786_v1, %v2130_v50 }
 0x158   : > { %v1960_v4 = vmul.f32 %v3698_v36, %v4038_v2  ;;  %v1487_v6 = vadd.f32 %v1455_v29, %v1386_v55  ;;  %v1657_v53 = vmul.f32 %v3670_v13, %v3993_v9  ;;  %v2061_v56 = vmul.f32 %v3715_v47, %v4034_v58  ;;  %1201 = vst.msk [vmem:[#allocation2 + $0x159] sm:$0xff] %vm680_vm1, %v1168_v63 }
 0x159   : > { %v2092_v10 = vadd.f32 %v2060_v19, %v1991_v40  ;;  %v1789_v60 = vadd.f32 %v1757_v27, %v1688_v62  ;;  %1200 = vst.msk [vmem:[#allocation2 + $0x151] sm:$0xff] %vm680_vm1, %v1167_v0  ;;  %v1758_v12 = vmul.f32 %v3675_v14, %v3989_v5  ;;  %3166 = vmatmul.mubr.msk.f32.gmra.mrb[6].mxu1 %vm680_vm1, %v2169_v28  ;;  %v4089_v40 = vld [vmem:[#allocation2 + $0xb0] sm:$0xff] }
 0x15a   : > { %v1588_v16 = vadd.f32 %v1556_v61, %v1487_v6  ;;  %v1254_v19 = vmul.f32 %v3636_v43, %v3964_v25  ;;  %v1355_v8 = vmul.f32 %v3641_v45, %v3976_v49  ;;  %v1456_v38 = vmul.f32 %v3653_v59, %v3966_v57 }
 0x15b   : > { %v2131_v33 = vmul.f32 %v3772_v48, %v2092_v10  ;;  %v1891_v21 = vadd.f32 %v1859_v54, %v1789_v60  ;;  %v1860_v27 = vmul.f32 %v3710_v46, %v4054_v3  ;;  %v1961_v7 = vmul.f32 %v3698_v36, %v4056_v17 }
 0x15c   : > { %v1689_v24 = vadd.f32 %v1657_v53, %v1588_v16  ;;  %v2062_v20 = vmul.f32 %v3715_v47, %v4051_v15  ;;  %v1387_v25 = vadd.f32 %v1355_v8, %v1254_v19  ;;  %v1557_v49 = vmul.f32 %v3681_v18, %v4027_v44 }
 0x15d   : > { %v2170_v26 = vadd.f32 %v3786_v1, %v2131_v33  ;;  %v1992_v57 = vadd.f32 %v1960_v4, %v1891_v21  ;;  %v1658_v32 = vmul.f32 %v3670_v13, %v4038_v2  ;;  %v1759_v34 = vmul.f32 %v3675_v14, %v4034_v58  ;;  %v4100_v4 = vld [vmem:[#allocation2 + $0xb1] sm:$0xff]  ;;  %v4113_v33 = vld [vmem:[#allocation2 + $0xc2] sm:$0xff] }
 0x15e   : > { %v1790_v30 = vadd.f32 %v1758_v12, %v1689_v24  ;;  %v1488_v29 = vadd.f32 %v1456_v38, %v1387_v25  ;;  %v1099_v39 = vmul.f32 %v3941_v52, %v3623_v35  ;;  %v1098_v42 = vmul.f32 %v3623_v35, %v3945_v11 }
 0x15f   : > { %3168 = vmatprep.mubr.msk.f32.mxu1 %vm680_vm1, %v2170_v26  ;;  %v2093_v23 = vadd.f32 %v2061_v56, %v1992_v57  ;;  %v1255_v41 = vmul.f32 %v3636_v43, %v3991_v51  ;;  %v1356_v50 = vmul.f32 %v3641_v45, %v3993_v9  ;;  %v1457_v54 = vmul.f32 %v3653_v59, %v3989_v5  ;;  %v4096_v51 = vld [vmem:[#allocation2 + $0xb2] sm:$0xff] }
 0x160   : > { %v1892_v55 = vadd.f32 %v1860_v27, %v1790_v30  ;;  %v1589_v61 = vadd.f32 %v1557_v49, %v1488_v29  ;;  %v1138_v52 = vadd.f32 %v3628_v37, %v1099_v39  ;;  %v1137_v11 = vadd.f32 %v3628_v37, %v1098_v42  ;;  %v4116_v27 = vld [vmem:[#allocation2 + $0xc0] sm:$0xff] }
 0x161   : > { %v2132_v62 = vmul.f32 %v3772_v48, %v2093_v23  ;;  %v1861_v63 = vmul.f32 %v3710_v46, %v4089_v40  ;;  %v1388_v0 = vadd.f32 %v1356_v50, %v1255_v41  ;;  %v1558_v9 = vmul.f32 %v3681_v18, %v4054_v3 }
 0x162   : > { %v1993_v5 = vadd.f32 %v1961_v7, %v1892_v55  ;;  %v1690_v28 = vadd.f32 %v1658_v32, %v1589_v61  ;;  %v1170_v6 = vmax.f32 %v1138_v52, 0.0  ;;  %v1169_v53 = vmax.f32 %v1137_v11, 0.0  ;;  %v4118_v7 = vld [vmem:[#allocation2 + $0xc1] sm:$0xff] }
 0x163   : > { %v2171_v10 = vadd.f32 %v3786_v1, %v2132_v62  ;;  %v1962_v60 = vmul.f32 %v3698_v36, %v4100_v4  ;;  %v1489_v56 = vadd.f32 %v1457_v54, %v1388_v0  ;;  %v1659_v12 = vmul.f32 %v3670_v13, %v4056_v17  ;;  %v4151_v0 = vld [vmem:[#allocation2 + $0xc8] sm:$0xff] }
 0x164   : > { %v2094_v16 = vadd.f32 %v2062_v20, %v1993_v5  ;;  %v1791_v19 = vadd.f32 %v1759_v34, %v1690_v28  ;;  %v2063_v8 = vmul.f32 %v3715_v47, %v4096_v51  ;;  %1203 = vst.msk [vmem:[#allocation2 + $0x171] sm:$0xff] %vm680_vm1, %v1170_v6  ;;  %1202 = vst.msk [vmem:[#allocation2 + $0x169] sm:$0xff] %vm680_vm1, %v1169_v53 }
 0x165   : > { %v1760_v38 = vmul.f32 %v3675_v14, %v4051_v15  ;;  %3169 = vmatmul.mubr.msk.f32.gmra.mrb[8].mxu1 %vm680_vm1, %v2171_v10  ;;  %v1590_v21 = vadd.f32 %v1558_v9, %v1489_v56  ;;  %v1256_v24 = vmul.f32 %v3636_v43, %v4027_v44  ;;  %v1357_v20 = vmul.f32 %v3641_v45, %v4038_v2 }
 0x166   : > { %v1458_v25 = vmul.f32 %v3653_v59, %v4034_v58  ;;  %v2133_v49 = vmul.f32 %v3772_v48, %v2094_v16  ;;  %v1893_v26 = vadd.f32 %v1861_v63, %v1791_v19  ;;  %v1862_v57 = vmul.f32 %v3710_v46, %v4116_v27  ;;  %v2028_v16 = vld [vmem:[#allocation2 + $0xca] sm:$0xff] }
 0x167   : > { %v1963_v32 = vmul.f32 %v3698_v36, %v4118_v7  ;;  %v1691_v34 = vadd.f32 %v1659_v12, %v1590_v21  ;;  %v2064_v30 = vmul.f32 %v3715_v47, %v4113_v33  ;;  %v1389_v44 = vadd.f32 %v1357_v20, %v1256_v24  ;;  %v1927_v12 = vld [vmem:[#allocation2 + $0xc9] sm:$0xff] }
 0x168   : > { %v1559_v2 = vmul.f32 %v3681_v18, %v4089_v40  ;;  %v2172_v29 = vadd.f32 %v3786_v1, %v2133_v49  ;;  %v1994_v58 = vadd.f32 %v1962_v60, %v1893_v26  ;;  %v1660_v39 = vmul.f32 %v3670_v13, %v4100_v4  ;;  %v1827_v26 = vld [vmem:[#allocation2 + $0xd8] sm:$0xff] }
 0x169   : > { %v1761_v42 = vmul.f32 %v3675_v14, %v4096_v51  ;;  %v1792_v23 = vadd.f32 %v1760_v38, %v1691_v34  ;;  %v1490_v41 = vadd.f32 %v1458_v25, %v1389_v44  ;;  %v1101_v50 = vmul.f32 %v3962_v22, %v3623_v35  ;;  %v2029_v34 = vld [vmem:[#allocation2 + $0xda] sm:$0xff] }
 0x16a   : > { %v1100_v54 = vmul.f32 %v3623_v35, %v3969_v31  ;;  %3171 = vmatprep.mubr.msk.f32.mxu1 %vm680_vm1, %v2172_v29  ;;  %v2095_v55 = vadd.f32 %v2063_v8, %v1994_v58  ;;  %v1257_v61 = vmul.f32 %v3636_v43, %v4054_v3  ;;  %v1358_v52 = vmul.f32 %v3641_v45, %v4056_v17  ;;  %v4185_v58 = vld [vmem:[%s4716_s4] ss:$0 sm:$0xff] }
 0x16b   : > { %v1459_v11 = vmul.f32 %v3653_v59, %v4051_v15  ;;  %v1894_v62 = vadd.f32 %v1862_v57, %v1792_v23  ;;  %v1591_v63 = vadd.f32 %v1559_v2, %v1490_v41  ;;  %v1140_v22 = vadd.f32 %v3628_v37, %v1101_v50  ;;  %v1928_v2 = vld [vmem:[#allocation2 + $0xd9] sm:$0xff] }
 0x16c   : > { %v1139_v35 = vadd.f32 %v3628_v37, %v1100_v54  ;;  %v2134_v31 = vmul.f32 %v3772_v48, %v2095_v55  ;;  %v1863_v9 = vmul.f32 %v3710_v46, %v4151_v0  ;;  %v1390_v3 = vadd.f32 %v1358_v52, %v1257_v61  ;;  %v1828_v52 = vld [vmem:[#allocation2 + $0xe0] sm:$0xff] }
 0x16d   : > { %v1560_v17 = vmul.f32 %v3681_v18, %v4116_v27  ;;  %v1995_v5 = vadd.f32 %v1963_v32, %v1894_v62  ;;  %v1692_v28 = vadd.f32 %v1660_v39, %v1591_v63  ;;  %v1172_v15 = vmax.f32 %v1140_v22, 0.0 }
 0x16e   : > { %v1171_v6 = vmax.f32 %v1139_v35, 0.0  ;;  %v2173_v53 = vadd.f32 %v3786_v1, %v2134_v31  ;;  %v1491_v10 = vadd.f32 %v1459_v11, %v1390_v3  ;;  %v1661_v60 = vmul.f32 %v3670_v13, %v4118_v7  ;;  %v2030_v35 = vld [vmem:[#allocation2 + $0xe2] sm:$0xff] }
 0x16f   : > { %v2096_v37 = vadd.f32 %v2064_v30, %v1995_v5  ;;  %v1793_v56 = vadd.f32 %v1761_v42, %v1692_v28  ;;  %1205 = vst.msk [vmem:[#allocation2 + $0x189] sm:$0xff] %vm680_vm1, %v1172_v15  ;;  %v1258_v8 = vmul.f32 %v3636_v43, %v4089_v40  ;;  %v1359_v38 = vmul.f32 %v3641_v45, %v4100_v4  ;;  %v4192_v42 = vld [vmem:[%s4716_s4 + $0x1] ss:$0 sm:$0xff] }
 0x170   : > { %1204 = vst.msk [vmem:[#allocation2 + $0x181] sm:$0xff] %vm680_vm1, %v1171_v6  ;;  %3172 = vmatmul.mubr.msk.f32.gmra.mrb[10].mxu1 %vm680_vm1, %v2173_v53  ;;  %v1592_v19 = vadd.f32 %v1560_v17, %v1491_v10  ;;  %v1460_v21 = vmul.f32 %v3653_v59, %v4096_v51  ;;  %v1964_v25 = vmul.f32 %v3698_v36, %v1927_v12  ;;  %v1929_v17 = vld [vmem:[#allocation2 + $0xe1] sm:$0xff] }
 0x171   : > { %v2135_v24 = vmul.f32 %v3772_v48, %v2096_v37  ;;  %v1895_v20 = vadd.f32 %v1863_v9, %v1793_v56  ;;  %v1762_v49 = vmul.f32 %v3675_v14, %v4113_v33  ;;  %v1864_v32 = vmul.f32 %v3710_v46, %v1827_v26  ;;  %v4214_v6 = vld [vmem:[%s4716_s4 + $0x2] ss:$0 sm:$0xff]  ;;  %v4218_v56 = vld [vmem:[#allocation2 + $0xf0] sm:$0xff] }
 0x172   : > { %v1693_v57 = vadd.f32 %v1661_v60, %v1592_v19  ;;  %v1391_v43 = vadd.f32 %v1359_v38, %v1258_v8  ;;  %v1561_v45 = vmul.f32 %v3681_v18, %v4151_v0  ;;  %v2065_v4 = vmul.f32 %v3715_v47, %v2028_v16 }
 0x173   : > { %v2174_v40 = vadd.f32 %v3786_v1, %v2135_v24  ;;  %v1996_v51 = vadd.f32 %v1964_v25, %v1895_v20  ;;  %v1662_v30 = vmul.f32 %v3670_v13, %v1927_v12  ;;  %v1259_v39 = vmul.f32 %v4185_v58, %v4116_v27  ;;  %v2031_v24 = vld [vmem:[#allocation2 + $0xf2] sm:$0xff]  ;;  %v4229_v20 = vld [vmem:[%s4716_s4 + $0x4] ss:$0 sm:$0xff] }
 0x174   : > { %v1794_v44 = vadd.f32 %v1762_v49, %v1693_v57  ;;  %v1492_v29 = vadd.f32 %v1460_v21, %v1391_v43  ;;  %v1360_v23 = vmul.f32 %v4192_v42, %v4118_v7  ;;  %v1965_v50 = vmul.f32 %v3698_v36, %v1928_v2  ;;  %v1930_v49 = vld [vmem:[#allocation2 + $0xf1] sm:$0xff] }
 0x175   : > { %3174 = vmatprep.mubr.msk.f32.mxu1 %vm680_vm1, %v2174_v40  ;;  %v2097_v41 = vadd.f32 %v2065_v4, %v1996_v51  ;;  %v2066_v54 = vmul.f32 %v3715_v47, %v2029_v34  ;;  %v1461_v55 = vmul.f32 %v3653_v59, %v4113_v33  ;;  %v1562_v62 = vmul.f32 %v3681_v18, %v1827_v26 }
 0x176   : > { %v1896_v61 = vadd.f32 %v1864_v32, %v1794_v44  ;;  %v1593_v27 = vadd.f32 %v1561_v45, %v1492_v29  ;;  %v1392_v11 = vadd.f32 %v1360_v23, %v1259_v39  ;;  %v1763_v7 = vmul.f32 %v3675_v14, %v2028_v16  ;;  %v4238_v44 = vld [vmem:[#allocation2 + $0xf8] sm:$0xff] }
 0x177   : > { %v2136_v63 = vmul.f32 %v3772_v48, %v2097_v41  ;;  %v1865_v22 = vmul.f32 %v3710_v46, %v1828_v52  ;;  %v1663_v31 = vmul.f32 %v3670_v13, %v1928_v2  ;;  %v1260_v59 = vmul.f32 %v4185_v58, %v4151_v0  ;;  %v2032_v41 = vld [vmem:[#allocation2 + $0xfa] sm:$0xff] }
 0x178   : > { %v1997_v9 = vadd.f32 %v1965_v50, %v1896_v61  ;;  %v1694_v3 = vadd.f32 %v1662_v30, %v1593_v27  ;;  %v1493_v5 = vadd.f32 %v1461_v55, %v1392_v11  ;;  %v1966_v28 = vmul.f32 %v3698_v36, %v1929_v17 }
 0x179   : > { %v2175_v33 = vadd.f32 %v3786_v1, %v2136_v63  ;;  %v1361_v15 = vmul.f32 %v4192_v42, %v1927_v12  ;;  %v1462_v13 = vmul.f32 %v4214_v6, %v2028_v16  ;;  %v2067_v60 = vmul.f32 %v3715_v47, %v2030_v35 }
 0x17a   : > { %v2098_v53 = vadd.f32 %v2066_v54, %v1997_v9  ;;  %v1795_v10 = vadd.f32 %v1763_v7, %v1694_v3  ;;  %v1594_v37 = vadd.f32 %v1562_v62, %v1493_v5  ;;  %v1764_v0 = vmul.f32 %v3675_v14, %v2029_v34  ;;  %v1931_v62 = vld [vmem:[#allocation2 + $0xf9] sm:$0xff] }
 0x17b   : > { %3175 = vmatmul.mubr.msk.f32.gmra.mrb[12].mxu1 %vm680_vm1, %v2175_v33  ;;  %v1866_v12 = vmul.f32 %v3710_v46, %v4218_v56  ;;  %v1393_v19 = vadd.f32 %v1361_v15, %v1260_v59  ;;  %v1563_v8 = vmul.f32 %v3681_v18, %v1828_v52  ;;  %v1664_v25 = vmul.f32 %v4229_v20, %v1929_v17 }
 0x17c   : > { %v2137_v38 = vmul.f32 %v3772_v48, %v2098_v53  ;;  %v1897_v16 = vadd.f32 %v1865_v22, %v1795_v10  ;;  %v1695_v21 = vadd.f32 %v1663_v31, %v1594_v37  ;;  %v1261_v57 = vmul.f32 %v4185_v58, %v1827_v26  ;;  %v4243_v26 = vld [vmem:[%s4716_s4 + $0x3] ss:$0 sm:$0xff]  ;;  %v4280_v53 = vld [vmem:[%s4716_s4 + $0x6] ss:$0 sm:$0xff] }
 0x17d   : > { %v1494_v14 = vadd.f32 %v1462_v13, %v1393_v19  ;;  %v1362_v32 = vmul.f32 %v4192_v42, %v1928_v2  ;;  %v1463_v18 = vmul.f32 %v4214_v6, %v2029_v34  ;;  %v1967_v51 = vmul.f32 %v3698_v36, %v1930_v49  ;;  %v4251_v36 = vld [vmem:[%s4716_s4 + $0x5] ss:$0 sm:$0xff] }
 0x17e   : > { %v2176_v43 = vadd.f32 %v3786_v1, %v2137_v38  ;;  %v1998_v45 = vadd.f32 %v1966_v28, %v1897_v16  ;;  %v1796_v40 = vadd.f32 %v1764_v0, %v1695_v21  ;;  %v2068_v4 = vmul.f32 %v3715_v47, %v2031_v24  ;;  %v1932_v16 = vld [vmem:[#allocation2 + $0x109] sm:$0xff] }
 0x17f   : > { %v1595_v30 = vadd.f32 %v1563_v8, %v1494_v14  ;;  %v1394_v29 = vadd.f32 %v1362_v32, %v1261_v57  ;;  %v1564_v34 = vmul.f32 %v4243_v26, %v4218_v56  ;;  %v1765_v47 = vmul.f32 %v4251_v36, %v2030_v35 }
 0x180   : > { %3177 = vmatprep.mubr.msk.f32.mxu1 %vm680_vm1, %v2176_v43  ;;  %v2099_v2 = vadd.f32 %v2067_v60, %v1998_v45  ;;  %v1898_v39 = vadd.f32 %v1866_v12, %v1796_v40  ;;  %v1867_v23 = vmul.f32 %v3710_v46, %v4238_v44  ;;  %v1665_v55 = vmul.f32 %v4229_v20, %v1930_v49  ;;  %v4264_v46 = vld [vmem:[%s4716_s4 + $0x7] ss:$0 sm:$0xff]  ;;  %v2033_v60 = vld [vmem:[#allocation2 + $0x10a] sm:$0xff] }
 0x181   : > { %v1696_v50 = vadd.f32 %v1664_v25, %v1595_v30  ;;  %v1495_v54 = vadd.f32 %v1463_v18, %v1394_v29  ;;  %v1262_v61 = vmul.f32 %v4185_v58, %v1828_v52  ;;  %v1363_v63 = vmul.f32 %v4192_v42, %v1929_v17  ;;  %v4270_v52 = vld [vmem:[%s4716_s4 + $0x8] ss:$0 sm:$0xff]  ;;  %v1832_v40 = vld [vmem:[#allocation2 + $0x110] sm:$0xff] }
 0x182   : > { %v2138_v27 = vmul.f32 %v3772_v48, %v2099_v2  ;;  %v1999_v11 = vadd.f32 %v1967_v51, %v1898_v39  ;;  %v1464_v7 = vmul.f32 %v4214_v6, %v2030_v35  ;;  %v1968_v31 = vmul.f32 %v4264_v46, %v1931_v62  ;;  %v1831_v35 = vld [vmem:[#allocation2 + $0x108] sm:$0xff]  ;;  %v2034_v30 = vld [vmem:[#allocation2 + $0x112] sm:$0xff] }
 0x183   : > { %v1797_v22 = vadd.f32 %v1765_v47, %v1696_v50  ;;  %v2069_v9 = vmul.f32 %v4270_v52, %v2032_v41  ;;  %v1596_v3 = vadd.f32 %v1564_v34, %v1495_v54  ;;  %v1395_v59 = vadd.f32 %v1363_v63, %v1262_v61  ;;  %v1933_v39 = vld [vmem:[#allocation2 + $0x111] sm:$0xff] }
 0x184   : > { %v2177_v17 = vadd.f32 %v3786_v1, %v2138_v27  ;;  %v2100_v5 = vadd.f32 %v2068_v4, %v1999_v11  ;;  %v1565_v33 = vmul.f32 %v4243_v26, %v4238_v44  ;;  %v1766_v13 = vmul.f32 %v4251_v36, %v2031_v24 }
 0x185   : > { %v1899_v28 = vadd.f32 %v1867_v23, %v1797_v22  ;;  %v1697_v15 = vadd.f32 %v1665_v55, %v1596_v3  ;;  %v1868_v10 = vmul.f32 %v4280_v53, %v1831_v35  ;;  %v1496_v0 = vadd.f32 %v1464_v7, %v1395_v59  ;;  %v1934_v59 = vld [vmem:[#allocation2 + $0x121] sm:$0xff] }
 0x186   : > { %3178 = vmatmul.mubr.msk.f32.gmra.mrb[14].mxu1 %vm680_vm1, %v2177_v17  ;;  %v2139_v37 = vmul.f32 %v3772_v48, %v2100_v5  ;;  %v1666_v12 = vmul.f32 %v4229_v20, %v1931_v62  ;;  %v1263_v19 = vmul.f32 %v4185_v58, %v4218_v56  ;;  %v1364_v21 = vmul.f32 %v4192_v42, %v1930_v49 }
 0x187   : > { %v2000_v8 = vadd.f32 %v1968_v31, %v1899_v28  ;;  %v1798_v38 = vadd.f32 %v1766_v13, %v1697_v15  ;;  %v1465_v25 = vmul.f32 %v4214_v6, %v2031_v24  ;;  %v1969_v57 = vmul.f32 %v4264_v46, %v1932_v16  ;;  %v1833_v31 = vld [vmem:[#allocation2 + $0x120] sm:$0xff] }
 0x188   : > { %v2178_v14 = vadd.f32 %v3786_v1, %v2139_v37  ;;  %v2070_v32 = vmul.f32 %v4270_v52, %v2033_v60  ;;  %v1597_v18 = vadd.f32 %v1565_v33, %v1496_v0  ;;  %v1396_v51 = vadd.f32 %v1364_v21, %v1263_v19  ;;  %v2035_v33 = vld [vmem:[#allocation2 + $0x122] sm:$0xff] }
 0x189   : > { %v2101_v43 = vadd.f32 %v2069_v9, %v2000_v8  ;;  %v1900_v45 = vadd.f32 %v1868_v10, %v1798_v38  ;;  %v1566_v56 = vmul.f32 %v4243_v26, %v1831_v35  ;;  %v1767_v49 = vmul.f32 %v4251_v36, %v2032_v41  ;;  %v4322_v10 = vld [vmem:[%s4718_s6] ss:$0 sm:$0xff]  ;;  %v1834_v21 = vld [vmem:[#allocation2 + $0x128] sm:$0xff] }
 0x18a   : > { %3180 = vmatprep.mubr.msk.f32.mxu1 %vm680_vm1, %v2178_v14  ;;  %v1698_v4 = vadd.f32 %v1666_v12, %v1597_v18  ;;  %v1869_v24 = vmul.f32 %v4280_v53, %v1832_v40  ;;  %v1667_v29 = vmul.f32 %v4229_v20, %v1932_v16  ;;  %v1497_v47 = vadd.f32 %v1465_v25, %v1396_v51 }
 0x18b   : > { %v2140_v34 = vmul.f32 %v3772_v48, %v2101_v43  ;;  %v2001_v2 = vadd.f32 %v1969_v57, %v1900_v45  ;;  %v1264_v23 = vmul.f32 %v4185_v58, %v4238_v44  ;;  %v1970_v54 = vmul.f32 %v4264_v46, %v1933_v39  ;;  %v2036_v45 = vld [vmem:[#allocation2 + $0x12a] sm:$0xff] }
 0x18c   : > { %v1799_v50 = vadd.f32 %v1767_v49, %v1698_v4  ;;  %v1365_v55 = vmul.f32 %v4192_v42, %v1931_v62  ;;  %v1466_v61 = vmul.f32 %v4214_v6, %v2032_v41  ;;  %v2071_v63 = vmul.f32 %v4270_v52, %v2034_v30  ;;  %v4312_v62 = vld [vmem:[%s4717_s5] ss:$0 sm:$0xff]  ;;  %v1935_v4 = vld [vmem:[#allocation2 + $0x129] sm:$0xff] }
 0x18d   : > { %v2179_v27 = vadd.f32 %v3786_v1, %v2140_v34  ;;  %v2102_v11 = vadd.f32 %v2070_v32, %v2001_v2  ;;  %v1598_v7 = vadd.f32 %v1566_v56, %v1497_v47  ;;  %v1768_v22 = vmul.f32 %v4251_v36, %v2033_v60 }
 0x18e   : > { %v1901_v48 = vadd.f32 %v1869_v24, %v1799_v50  ;;  %v1397_v9 = vadd.f32 %v1365_v55, %v1264_v23  ;;  %v1567_v44 = vmul.f32 %v4243_v26, %v1832_v40  ;;  %v1870_v3 = vmul.f32 %v4280_v53, %v1833_v31  ;;  %v1835_v55 = vld [vmem:[#allocation2 + $0x138] sm:$0xff] }
 0x18f   : > { %3181 = vmatmul.mubr.msk.f32.gmra.mrb[16].mxu1 %vm680_vm1, %v2179_v27  ;;  %v2141_v1 = vmul.f32 %v4312_v62, %v2102_v11  ;;  %v1699_v41 = vadd.f32 %v1667_v29, %v1598_v7  ;;  %v1668_v17 = vmul.f32 %v4229_v20, %v1933_v39  ;;  %v1265_v15 = vmul.f32 %v4185_v58, %v1831_v35 }
 0x190   : > { %v2002_v5 = vadd.f32 %v1970_v54, %v1901_v48  ;;  %v1498_v28 = vadd.f32 %v1466_v61, %v1397_v9  ;;  %v1366_v13 = vmul.f32 %v4192_v42, %v1932_v16  ;;  %v1971_v12 = vmul.f32 %v4264_v46, %v1934_v59 }
 0x191   : > { %v2180_v37 = vadd.f32 %v4322_v10, %v2141_v1  ;;  %v1800_v0 = vadd.f32 %v1768_v22, %v1699_v41  ;;  %v1467_v19 = vmul.f32 %v4214_v6, %v2033_v60  ;;  %v1568_v35 = vmul.f32 %v4243_v26, %v1833_v31  ;;  %v1936_v41 = vld [vmem:[#allocation2 + $0x139] sm:$0xff] }
 0x192   : > { %v2103_v8 = vadd.f32 %v2071_v63, %v2002_v5  ;;  %v1599_v38 = vadd.f32 %v1567_v44, %v1498_v28  ;;  %v1398_v25 = vadd.f32 %v1366_v13, %v1265_v15  ;;  %v2072_v14 = vmul.f32 %v4270_v52, %v2035_v33  ;;  %v2037_v63 = vld [vmem:[#allocation2 + $0x13a] sm:$0xff] }
 0x193   : > { %3183 = vmatprep.mubr.msk.f32.mxu1 %vm680_vm1, %v2180_v37  ;;  %v1902_v16 = vadd.f32 %v1870_v3, %v1800_v0  ;;  %v1769_v57 = vmul.f32 %v4251_v36, %v2034_v30  ;;  %v1871_v32 = vmul.f32 %v4280_v53, %v1834_v21  ;;  %v1669_v51 = vmul.f32 %v4229_v20, %v1934_v59 }
 0x194   : > { %v2142_v18 = vmul.f32 %v4312_v62, %v2103_v8  ;;  %v1700_v43 = vadd.f32 %v1668_v17, %v1599_v38  ;;  %v1499_v60 = vadd.f32 %v1467_v19, %v1398_v25  ;;  %v1266_v49 = vmul.f32 %v4185_v58, %v1832_v40  ;;  %v2038_v38 = vld [vmem:[#allocation2 + $0x142] sm:$0xff] }
 0x195   : > { %v2003_v56 = vadd.f32 %v1971_v12, %v1902_v16  ;;  %v1367_v24 = vmul.f32 %v4192_v42, %v1933_v39  ;;  %v1468_v29 = vmul.f32 %v4214_v6, %v2034_v30  ;;  %v1972_v47 = vmul.f32 %v4264_v46, %v1935_v4  ;;  %v1836_v12 = vld [vmem:[#allocation2 + $0x140] sm:$0xff] }
 0x196   : > { %v2181_v34 = vadd.f32 %v4322_v10, %v2142_v18  ;;  %v1801_v2 = vadd.f32 %v1769_v57, %v1700_v43  ;;  %v1600_v23 = vadd.f32 %v1568_v35, %v1499_v60  ;;  %v2073_v54 = vmul.f32 %v4270_v52, %v2036_v45 }
 0x197   : > { %v2104_v50 = vadd.f32 %v2072_v14, %v2003_v56  ;;  %v1399_v61 = vadd.f32 %v1367_v24, %v1266_v49  ;;  %v1569_v27 = vmul.f32 %v4243_v26, %v1834_v21  ;;  %v1770_v39 = vmul.f32 %v4251_v36, %v2035_v33  ;;  %v1937_v14 = vld [vmem:[#allocation2 + $0x141] sm:$0xff] }
 0x198   : > { %3184 = vmatmul.mubr.msk.f32.gmra.mrb[18].mxu1 %vm680_vm1, %v2181_v34  ;;  %v1903_v40 = vadd.f32 %v1871_v32, %v1801_v2  ;;  %v1701_v11 = vadd.f32 %v1669_v51, %v1600_v23  ;;  %v1872_v30 = vmul.f32 %v4280_v53, %v1835_v55  ;;  %v1670_v22 = vmul.f32 %v4229_v20, %v1935_v4 }
 0x199   : > { %v2143_v7 = vmul.f32 %v4312_v62, %v2104_v50  ;;  %v1500_v48 = vadd.f32 %v1468_v29, %v1399_v61  ;;  %v1267_v9 = vmul.f32 %v4185_v58, %v1833_v31  ;;  %v1368_v3 = vmul.f32 %v4192_v42, %v1934_v59 }
 0x19a   : > { %v2004_v44 = vadd.f32 %v1972_v47, %v1903_v40  ;;  %v1802_v1 = vadd.f32 %v1770_v39, %v1701_v11  ;;  %v1469_v17 = vmul.f32 %v4214_v6, %v2035_v33  ;;  %v1973_v28 = vmul.f32 %v4264_v46, %v1936_v41  ;;  %v1837_v47 = vld [vmem:[#allocation2 + $0x150] sm:$0xff] }
 0x19b   : > { %v2182_v5 = vadd.f32 %v4322_v10, %v2143_v7  ;;  %v2074_v15 = vmul.f32 %v4270_v52, %v2037_v63  ;;  %v1601_v13 = vadd.f32 %v1569_v27, %v1500_v48  ;;  %v1400_v19 = vadd.f32 %v1368_v3, %v1267_v9  ;;  %v1938_v27 = vld [vmem:[#allocation2 + $0x151] sm:$0xff] }
 0x19c   : > { %v2105_v37 = vadd.f32 %v2073_v54, %v2004_v44  ;;  %v1904_v0 = vadd.f32 %v1872_v30, %v1802_v1  ;;  %v1570_v31 = vmul.f32 %v4243_v26, %v1835_v55  ;;  %v1771_v59 = vmul.f32 %v4251_v36, %v2036_v45  ;;  %v2039_v40 = vld [vmem:[#allocation2 + $0x152] sm:$0xff] }
 0x19d   : > { %3186 = vmatprep.mubr.msk.f32.mxu1 %vm680_vm1, %v2182_v5  ;;  %v1702_v8 = vadd.f32 %v1670_v22, %v1601_v13  ;;  %v1873_v33 = vmul.f32 %v4280_v53, %v1836_v12  ;;  %v1671_v25 = vmul.f32 %v4229_v20, %v1936_v41  ;;  %v1501_v57 = vadd.f32 %v1469_v17, %v1400_v19  ;;  %v1838_v3 = vld [vmem:[#allocation2 + $0x158] sm:$0xff] }
 0x19e   : > { %v2144_v35 = vmul.f32 %v4312_v62, %v2105_v37  ;;  %v2005_v16 = vadd.f32 %v1973_v28, %v1904_v0  ;;  %v1268_v32 = vmul.f32 %v4185_v58, %v1834_v21  ;;  %v1974_v43 = vmul.f32 %v4264_v46, %v1937_v14  ;;  %v2040_v0 = vld [vmem:[#allocation2 + $0x15a] sm:$0xff] }
 0x19f   : > { %v1803_v18 = vadd.f32 %v1771_v59, %v1702_v8  ;;  %v1369_v60 = vmul.f32 %v4192_v42, %v1935_v4  ;;  %v1470_v51 = vmul.f32 %v4214_v6, %v2036_v45  ;;  %v2075_v24 = vmul.f32 %v4270_v52, %v2038_v38  ;;  %v1939_v8 = vld [vmem:[#allocation2 + $0x159] sm:$0xff] }
 0x1a0   : > { %v2183_v56 = vadd.f32 %v4322_v10, %v2144_v35  ;;  %v2106_v49 = vadd.f32 %v2074_v15, %v2005_v16  ;;  %v1602_v29 = vadd.f32 %v1570_v31, %v1501_v57  ;;  %v1772_v2 = vmul.f32 %v4251_v36, %v2037_v63 }
 0x1a1   : > { %v1905_v34 = vadd.f32 %v1873_v33, %v1803_v18  ;;  %v1401_v23 = vadd.f32 %v1369_v60, %v1268_v32  ;;  %v1571_v21 = vmul.f32 %v4243_v26, %v1836_v12  ;;  %v1874_v45 = vmul.f32 %v4280_v53, %v1837_v47  ;;  %v1839_v60 = vld [vmem:[#allocation2 + $0x168] sm:$0xff] }
 0x1a2   : > { %3187 = vmatmul.mubr.msk.f32.gmra.mrb[20].mxu1 %vm680_vm1, %v2183_v56  ;;  %v2145_v50 = vmul.f32 %v4312_v62, %v2106_v49  ;;  %v1703_v4 = vadd.f32 %v1671_v25, %v1602_v29  ;;  %v1672_v54 = vmul.f32 %v4229_v20, %v1937_v14  ;;  %v1269_v39 = vmul.f32 %v4185_v58, %v1835_v55 }
 0x1a3   : > { %v2006_v61 = vadd.f32 %v1974_v43, %v1905_v34  ;;  %v1502_v11 = vadd.f32 %v1470_v51, %v1401_v23  ;;  %v1370_v30 = vmul.f32 %v4192_v42, %v1936_v41  ;;  %v1975_v22 = vmul.f32 %v4264_v46, %v1938_v27 }
 0x1a4   : > { %v2184_v7 = vadd.f32 %v4322_v10, %v2145_v50  ;;  %v1804_v48 = vadd.f32 %v1772_v2, %v1703_v4  ;;  %v1471_v9 = vmul.f32 %v4214_v6, %v2037_v63  ;;  %v1572_v5 = vmul.f32 %v4243_v26, %v1837_v47  ;;  %v1940_v4 = vld [vmem:[#allocation2 + $0x169] sm:$0xff] }
 0x1a5   : > { %v2107_v44 = vadd.f32 %v2075_v24, %v2006_v61  ;;  %v1603_v1 = vadd.f32 %v1571_v21, %v1502_v11  ;;  %v1402_v17 = vadd.f32 %v1370_v30, %v1269_v39  ;;  %v2076_v55 = vmul.f32 %v4270_v52, %v2039_v40  ;;  %v2041_v24 = vld [vmem:[#allocation2 + $0x16a] sm:$0xff] }
 0x1a6   : > { %3189 = vmatprep.mubr.msk.f32.mxu1 %vm680_vm1, %v2184_v7  ;;  %v1906_v28 = vadd.f32 %v1874_v45, %v1804_v48  ;;  %v1773_v41 = vmul.f32 %v4251_v36, %v2038_v38  ;;  %v1875_v15 = vmul.f32 %v4280_v53, %v1838_v3  ;;  %v1673_v19 = vmul.f32 %v4229_v20, %v1938_v27 }
 0x1a7   : > { %v2146_v13 = vmul.f32 %v4312_v62, %v2107_v44  ;;  %v1704_v37 = vadd.f32 %v1672_v54, %v1603_v1  ;;  %v1503_v63 = vadd.f32 %v1471_v9, %v1402_v17  ;;  %v1270_v59 = vmul.f32 %v4185_v58, %v1836_v12  ;;  %v2042_v1 = vld [vmem:[#allocation2 + $0x172] sm:$0xff] }
 0x1a8   : > { %v2007_v31 = vadd.f32 %v1975_v22, %v1906_v28  ;;  %v1371_v33 = vmul.f32 %v4192_v42, %v1937_v14  ;;  %v1472_v25 = vmul.f32 %v4214_v6, %v2038_v38  ;;  %v1976_v57 = vmul.f32 %v4264_v46, %v1939_v8  ;;  %v1840_v22 = vld [vmem:[#allocation2 + $0x170] sm:$0xff] }
 0x1a9   : > { %v2185_v35 = vadd.f32 %v4322_v10, %v2146_v13  ;;  %v1805_v16 = vadd.f32 %v1773_v41, %v1704_v37  ;;  %v1604_v32 = vadd.f32 %v1572_v5, %v1503_v63  ;;  %v2077_v43 = vmul.f32 %v4270_v52, %v2040_v0 }
 0x1aa   : > { %v2108_v18 = vadd.f32 %v2076_v55, %v2007_v31  ;;  %v1403_v51 = vadd.f32 %v1371_v33, %v1270_v59  ;;  %v1573_v56 = vmul.f32 %v4243_v26, %v1838_v3  ;;  %v1774_v14 = vmul.f32 %v4251_v36, %v2039_v40  ;;  %v1941_v55 = vld [vmem:[#allocation2 + $0x171] sm:$0xff] }
 0x1ab   : > { %3190 = vmatmul.mubr.msk.f32.gmra.mrb[22].mxu1 %vm680_vm1, %v2185_v35  ;;  %v1907_v12 = vadd.f32 %v1875_v15, %v1805_v16  ;;  %v1705_v49 = vadd.f32 %v1673_v19, %v1604_v32  ;;  %v1876_v38 = vmul.f32 %v4280_v53, %v1839_v60  ;;  %v1674_v2 = vmul.f32 %v4229_v20, %v1939_v8  ;;  %v1942_v32 = vld [vmem:[#allocation2 + $0x181] sm:$0xff] }
 0x1ac   : > { %v2147_v29 = vmul.f32 %v4312_v62, %v2108_v18  ;;  %v1504_v34 = vadd.f32 %v1472_v25, %v1403_v51  ;;  %v1271_v23 = vmul.f32 %v4185_v58, %v1837_v47  ;;  %v1372_v45 = vmul.f32 %v4192_v42, %v1938_v27 }
 0x1ad   : > { %v2008_v21 = vadd.f32 %v1976_v57, %v1907_v12  ;;  %v1806_v50 = vadd.f32 %v1774_v14, %v1705_v49  ;;  %v1473_v54 = vmul.f32 %v4214_v6, %v2039_v40  ;;  %v1977_v11 = vmul.f32 %v4264_v46, %v1940_v4  ;;  %v1841_v57 = vld [vmem:[#allocation2 + $0x180] sm:$0xff] }
 0x1ae   : > { %v2186_v61 = vadd.f32 %v4322_v10, %v2147_v29  ;;  %v2078_v39 = vmul.f32 %v4270_v52, %v2041_v24  ;;  %v1605_v30 = vadd.f32 %v1573_v56, %v1504_v34  ;;  %v1404_v9 = vadd.f32 %v1372_v45, %v1271_v23  ;;  %v2043_v12 = vld [vmem:[#allocation2 + $0x182] sm:$0xff] }
 0x1af   : > { %v2109_v7 = vadd.f32 %v2077_v43, %v2008_v21  ;;  %v1908_v48 = vadd.f32 %v1876_v38, %v1806_v50  ;;  %v1574_v47 = vmul.f32 %v4243_v26, %v1839_v60  ;;  %v1775_v27 = vmul.f32 %v4251_v36, %v2040_v0  ;;  %v1842_v45 = vld [vmem:[#allocation2 + $0x188] sm:$0xff] }
 0x1b0   : > { %3192 = vmatprep.mubr.msk.f32.mxu1 %vm680_vm1, %v2186_v61  ;;  %v1706_v44 = vadd.f32 %v1674_v2, %v1605_v30  ;;  %v1877_v40 = vmul.f32 %v4280_v53, %v1840_v22  ;;  %v1675_v17 = vmul.f32 %v4229_v20, %v1940_v4  ;;  %v1505_v41 = vadd.f32 %v1473_v54, %v1404_v9 }
 0x1b1   : > { %v2148_v5 = vmul.f32 %v4312_v62, %v2109_v7  ;;  %v2009_v28 = vadd.f32 %v1977_v11, %v1908_v48  ;;  %v1272_v15 = vmul.f32 %v4185_v58, %v1838_v3  ;;  %v1978_v37 = vmul.f32 %v4264_v46, %v1941_v55  ;;  %v1943_v48 = vld [vmem:[#allocation2 + $0x189] sm:$0xff] }
 0x1b2   : > { %v1807_v13 = vadd.f32 %v1775_v27, %v1706_v44  ;;  %v1373_v63 = vmul.f32 %v4192_v42, %v1939_v8  ;;  %v1474_v19 = vmul.f32 %v4214_v6, %v2040_v0  ;;  %v2079_v33 = vmul.f32 %v4270_v52, %v2042_v1  ;;  %v1843_v44 = vld [vmem:[#allocation2 + $0x198] sm:$0xff] }
 0x1b3   : > { %v2187_v31 = vadd.f32 %v4322_v10, %v2148_v5  ;;  %v2110_v59 = vadd.f32 %v2078_v39, %v2009_v28  ;;  %v1606_v25 = vadd.f32 %v1574_v47, %v1505_v41  ;;  %v1776_v16 = vmul.f32 %v4251_v36, %v2041_v24 }
 0x1b4   : > { %v1909_v35 = vadd.f32 %v1877_v40, %v1807_v13  ;;  %v1405_v18 = vadd.f32 %v1373_v63, %v1272_v15  ;;  %v1575_v3 = vmul.f32 %v4243_v26, %v1840_v22  ;;  %v1878_v0 = vmul.f32 %v4280_v53, %v1841_v57  ;;  %v1944_v63 = vld [vmem:[#allocation2 + $0x199] sm:$0xff] }
 0x1b5   : > { %3193 = vmatmul.mubr.msk.f32.gmra.mrb[24].mxu1 %vm680_vm1, %v2187_v31  ;;  %v2149_v8 = vmul.f32 %v4312_v62, %v2110_v59  ;;  %v1707_v43 = vadd.f32 %v1675_v17, %v1606_v25  ;;  %v1676_v51 = vmul.f32 %v4229_v20, %v1941_v55  ;;  %v1273_v14 = vmul.f32 %v4185_v58, %v1839_v60 }
 0x1b6   : > { %v2010_v56 = vadd.f32 %v1978_v37, %v1909_v35  ;;  %v1506_v49 = vadd.f32 %v1474_v19, %v1405_v18  ;;  %v1374_v38 = vmul.f32 %v4192_v42, %v1940_v4  ;;  %v1979_v2 = vmul.f32 %v4264_v46, %v1942_v32  ;;  %v2044_v37 = vld [vmem:[#allocation2 + $0x18a] sm:$0xff] }
 0x1b7   : > { %v2188_v29 = vadd.f32 %v4322_v10, %v2149_v8  ;;  %v1808_v34 = vadd.f32 %v1776_v16, %v1707_v43  ;;  %v1475_v23 = vmul.f32 %v4214_v6, %v2041_v24  ;;  %v1576_v61 = vmul.f32 %v4243_v26, %v1841_v57  ;;  %v1844_v57 = vld [vmem:[#allocation2 + $0x1a0] sm:$0xff] }
 0x1b8   : > { %v2111_v21 = vadd.f32 %v2079_v33, %v2010_v56  ;;  %v1607_v50 = vadd.f32 %v1575_v3, %v1506_v49  ;;  %v1406_v54 = vadd.f32 %v1374_v38, %v1273_v14  ;;  %v2080_v60 = vmul.f32 %v4270_v52, %v2043_v12  ;;  %v2046_v14 = vld [vmem:[#allocation2 + $0x1a2] sm:$0xff] }
 0x1b9   : > { %3195 = vmatprep.mubr.msk.f32.mxu1 %vm680_vm1, %v2188_v29  ;;  %v1910_v11 = vadd.f32 %v1878_v0, %v1808_v34  ;;  %v1777_v4 = vmul.f32 %v4251_v36, %v2042_v1  ;;  %v1879_v39 = vmul.f32 %v4280_v53, %v1842_v45  ;;  %v1677_v9 = vmul.f32 %v4229_v20, %v1942_v32  ;;  %v1945_v0 = vld [vmem:[#allocation2 + $0x1a1] sm:$0xff] }
 0x1ba   : > { %v2150_v30 = vmul.f32 %v4312_v62, %v2111_v21  ;;  %v1708_v7 = vadd.f32 %v1676_v51, %v1607_v50  ;;  %v1507_v24 = vadd.f32 %v1475_v23, %v1406_v54  ;;  %v1274_v27 = vmul.f32 %v4185_v58, %v1840_v22 }
 0x1bb   : > { %v2011_v47 = vadd.f32 %v1979_v2, %v1910_v11  ;;  %v1375_v40 = vmul.f32 %v4192_v42, %v1941_v55  ;;  %v1476_v17 = vmul.f32 %v4214_v6, %v2042_v1  ;;  %v1980_v13 = vmul.f32 %v4264_v46, %v1943_v48  ;;  %v2045_v1 = vld [vmem:[#allocation2 + $0x19a] sm:$0xff] }
 0x1bc   : > { %v2189_v5 = vadd.f32 %v4322_v10, %v2150_v30  ;;  %v1809_v28 = vadd.f32 %v1777_v4, %v1708_v7  ;;  %v1608_v41 = vadd.f32 %v1576_v61, %v1507_v24  ;;  %v1577_v31 = vmul.f32 %v4243_v26, %v1842_v45  ;;  %v4467_v11 = vld [vmem:[%s4721_s9] ss:$0 sm:$0xff] }
 0x1bd   : > { %v2112_v15 = vadd.f32 %v2080_v60, %v2011_v47  ;;  %v1407_v19 = vadd.f32 %v1375_v40, %v1274_v27  ;;  %v1778_v42 = vmul.f32 %v4251_v36, %v2043_v12  ;;  %v1880_v6 = vmul.f32 %v4280_v53, %v1843_v44 }
 0x1be   : > { %3196 = vmatmul.mubr.msk.f32.gmra.mrb[26].mxu1 %vm680_vm1, %v2189_v5  ;;  %v1911_v59 = vadd.f32 %v1879_v39, %v1809_v28  ;;  %v1709_v58 = vadd.f32 %v1677_v9, %v1608_v41  ;;  %v1678_v33 = vmul.f32 %v4229_v20, %v1943_v48  ;;  %v2081_v35 = vmul.f32 %v4270_v52, %v2044_v37 }
 0x1bf   : > { %v2151_v22 = vmul.f32 %v4312_v62, %v2112_v15  ;;  %v1508_v55 = vadd.f32 %v1476_v17, %v1407_v19  ;;  %v1981_v26 = vmul.f32 %v4264_v46, %v1944_v63  ;;  %v2082_v43 = vmul.f32 %v4270_v52, %v2045_v1 }
 0x1c0   : > { %v2012_v25 = vadd.f32 %v1980_v13, %v1911_v59  ;;  %v1810_v16 = vadd.f32 %v1778_v42, %v1709_v58  ;;  %v1779_v20 = vmul.f32 %v4251_v36, %v2044_v37  ;;  %v1881_v56 = vmul.f32 %v4280_v53, %v1844_v57 }
 0x1c1   : > { %v2190_v32 = vadd.f32 %v4322_v10, %v2151_v22  ;;  %v1609_v18 = vadd.f32 %v1577_v31, %v1508_v55  ;;  %v1982_v29 = vmul.f32 %v4264_v46, %v1945_v0  ;;  %v2083_v21 = vmul.f32 %v4270_v52, %v2046_v14  ;;  %v4462_v52 = vld [vmem:[%s4720_s8] ss:$0 sm:$0xff] }
 0x1c2   : > { %v2113_v3 = vadd.f32 %v2081_v35, %v2012_v25  ;;  %v1912_v8 = vadd.f32 %v1880_v6, %v1810_v16 }
 0x1c3   : > { %3198 = vmatprep.mubr.msk.f32.mxu1 %vm680_vm1, %v2190_v32  ;;  %v1710_v51 = vadd.f32 %v1678_v33, %v1609_v18 }
 0x1c4   : > { %v2152_v12 = vmul.f32 %v4312_v62, %v2113_v3  ;;  %v2013_v49 = vadd.f32 %v1981_v26, %v1912_v8 }
 0x1c5   : > { %v1811_v38 = vadd.f32 %v1779_v20, %v1710_v51 }
 0x1c6   : > { %v2191_v34 = vadd.f32 %v4322_v10, %v2152_v12  ;;  %v2114_v2 = vadd.f32 %v2082_v43, %v2013_v49 }
 0x1c7   : > { %v1913_v23 = vadd.f32 %v1881_v56, %v1811_v38 }
 0x1c8   : > { %3199 = vmatmul.mubr.msk.f32.gmra.mrb[28].mxu1 %vm680_vm1, %v2191_v34  ;;  %v2153_v50 = vmul.f32 %v4312_v62, %v2114_v2 }
 0x1c9   : > { %v2014_v36 = vadd.f32 %v1982_v29, %v1913_v23 }
 0x1ca   : > { %v2192_v53 = vadd.f32 %v4322_v10, %v2153_v50 }
 0x1cb   : > { %v2115_v45 = vadd.f32 %v2083_v21, %v2014_v36 }
 0x1cc   : > { %3201 = vmatprep.mubr.msk.f32.mxu1 %vm680_vm1, %v2192_v53 }
 0x1cd   : > { %v2154_v54 = vmul.f32 %v4312_v62, %v2115_v45 }
 0x1cf   : > { %v2193_v46 = vadd.f32 %v4322_v10, %v2154_v54 }
 0x1d1   : > { %3202 = vmatmul.mubr.msk.f32.gmra.mrb[30].mxu1 %vm680_vm1, %v2193_v46 }
 0x205   : > { %v3158_v61 = vpop.f32.mrb[0].mxu1 }
 0x206   : > { %v2524_v60 = vmul.f32 %v3158_v61, %v4462_v52  ;;  %v2357_v4 = vpop.f32.mrb[1].mxu1 }
 0x207   : > { %v2523_v62 = vmul.f32 %v4462_v52, %v2357_v4 }
 0x208   : > { %v2563_v10 = vadd.f32 %v4467_v11, %v2524_v60 }
 0x209   : > { %v2562_v39 = vadd.f32 %v4467_v11, %v2523_v62 }
 0x20a   : > { %v2595_v30 = vmax.f32 %v2563_v10, 0.0 }
 0x20b   : > { %v2594_v7 = vmax.f32 %v2562_v39, 0.0 }
 0x20c   : > { %2692 = vrot.lane.b32.xlu0 %v2595_v30, %s3266_s30 }
 0x210   : > { %2690 = vrot.lane.b32.xlu0 %v2594_v7, %s3266_s30 }
 0x213   : > { %v3161_v48 = vpop.f32.mrb[2].mxu1 }
 0x214   : > { %v2526_v24 = vmul.f32 %v3161_v48, %v4462_v52  ;;  %v2367_v9 = vpop.f32.mrb[3].mxu1 }
 0x215   : > { %v2525_v47 = vmul.f32 %v4462_v52, %v2367_v9 }
 0x216   : > { %v2565_v44 = vadd.f32 %v4467_v11, %v2526_v24 }
 0x217   : > { %v2564_v27 = vadd.f32 %v4467_v11, %v2525_v47 }
 0x218   : > { %v2597_v40 = vmax.f32 %v2565_v44, 0.0 }
 0x219   : > { %v2596_v17 = vmax.f32 %v2564_v27, 0.0 }
 0x21a   : > { %2696 = vrot.lane.b32.xlu1 %v2597_v40, %s3266_s30 }
 0x21e   : > { %2694 = vrot.lane.b32.xlu1 %v2596_v17, %s3266_s30 }
 0x223   : > { %v3164_v5 = vpop.f32.mrb[4].mxu1 }
 0x224   : > { %v2528_v28 = vmul.f32 %v3164_v5, %v4462_v52  ;;  %v2377_v41 = vpop.f32.mrb[5].mxu1 }
 0x225   : > { %v2527_v15 = vmul.f32 %v4462_v52, %v2377_v41 }
 0x226   : > { %v2567_v13 = vadd.f32 %v4467_v11, %v2528_v28 }
 0x227   : > { %v2566_v37 = vadd.f32 %v4467_v11, %v2527_v15 }
 0x228   : > { %v2599_v63 = vmax.f32 %v2567_v13, 0.0 }
 0x229   : > { %v2598_v19 = vmax.f32 %v2566_v37, 0.0 }
 0x22a   : > { %2700 = vrot.lane.b32.xlu1 %v2599_v63, %s3266_s30 }
 0x22b   : > { %2698 = vrot.lane.b32.xlu0 %v2598_v19, %s3266_s30 }
 0x22c   : > { %v3167_v31 = vpop.f32.mrb[6].mxu1 }
 0x22d   : > { %v2530_v59 = vmul.f32 %v3167_v31, %v4462_v52  ;;  %v2387_v58 = vpop.f32.mrb[7].mxu1 }
 0x22e   : > { %v2529_v42 = vmul.f32 %v4462_v52, %v2387_v58 }
 0x22f   : > { %v2569_v6 = vadd.f32 %v4467_v11, %v2530_v59  ;;  %v2627_v59 = vld [vmem:[%s3551_s12 + $0x8] sm:$0xff] }
 0x230   : > { %v2568_v22 = vadd.f32 %v4467_v11, %v2529_v42 }
 0x231   : > { %v2601_v1 = vmax.f32 %v2569_v6, 0.0 }
 0x232   : > { %v2600_v55 = vmax.f32 %v2568_v22, 0.0 }
 0x233   : > { %2704 = vrot.lane.b32.xlu1 %v2601_v1, %s3266_s30  ;;  %v2626_v1 = vld [vmem:[%s3551_s12] sm:$0xff] }
 0x234   : > { %2702 = vrot.lane.b32.xlu0 %v2600_v55, %s3266_s30 }
 0x238   : > { %v3170_v33 = vpop.f32.mrb[8].mxu1 }
 0x239   : > { %v2532_v25 = vmul.f32 %v3170_v33, %v4462_v52  ;;  %v2397_v35 = vpop.f32.mrb[9].mxu1 }
 0x23a   : > { %v2531_v16 = vmul.f32 %v4462_v52, %v2397_v35 }
 0x23b   : > { %v2571_v26 = vadd.f32 %v4467_v11, %v2532_v25 }
 0x23c   : > { %v2570_v57 = vadd.f32 %v4467_v11, %v2531_v16 }
 0x23d   : > { %v2603_v32 = vmax.f32 %v2571_v26, 0.0 }
 0x23e   : > { %v2602_v18 = vmax.f32 %v2570_v57, 0.0 }
 0x23f   : > { %2708 = vrot.lane.b32.xlu1 %v2603_v32, %s3266_s30 }
 0x240   : > { %2706 = vrot.lane.b32.xlu0 %v2602_v18, %s3266_s30 }
 0x243   : > { %v3173_v3 = vpop.f32.mrb[10].mxu1 }
 0x244   : > { %v2534_v8 = vmul.f32 %v3173_v3, %v4462_v52  ;;  %v2407_v43 = vpop.f32.mrb[11].mxu1 }
 0x245   : > { %v2533_v0 = vmul.f32 %v4462_v52, %v2407_v43 }
 0x246   : > { %v2573_v51 = vadd.f32 %v4467_v11, %v2534_v8 }
 0x247   : > { %v2572_v20 = vadd.f32 %v4467_v11, %v2533_v0 }
 0x248   : > { %v2605_v56 = vmax.f32 %v2573_v51, 0.0 }
 0x249   : > { %v2604_v12 = vmax.f32 %v2572_v20, 0.0  ;;  %v2629_v20 = vld [vmem:[%s3551_s12 + $0x18] sm:$0xff] }
 0x24a   : > { %2712 = vrot.lane.b32.xlu1 %v2605_v56, %s3266_s30 }
 0x24b   : > { %2710 = vrot.lane.b32.xlu0 %v2604_v12, %s3266_s30 }
 0x24e   : > { %v3176_v49 = vpop.f32.mrb[12].mxu1 }
 0x24f   : > { %v2536_v14 = vmul.f32 %v3176_v49, %v4462_v52  ;;  %v2417_v38 = vpop.f32.mrb[13].mxu1 }
 0x250   : > { %v2535_v29 = vmul.f32 %v4462_v52, %v2417_v38 }
 0x251   : > { %v2575_v34 = vadd.f32 %v4467_v11, %v2536_v14 }
 0x252   : > { %v2574_v2 = vadd.f32 %v4467_v11, %v2535_v29  ;;  %v2628_v29 = vld [vmem:[%s3551_s12 + $0x10] sm:$0xff] }
 0x253   : > { %v2607_v23 = vmax.f32 %v2575_v34, 0.0 }
 0x254   : > { %v2606_v21 = vmax.f32 %v2574_v2, 0.0 }
 0x255   : > { %2716 = vrot.lane.b32.xlu1 %v2607_v23, %s3266_s30 }
 0x256   : > { %2714 = vrot.lane.b32.xlu0 %v2606_v21, %s3266_s30 }
 0x259   : > { %v3179_v50 = vpop.f32.mrb[14].mxu1 }
 0x25a   : > { %v2538_v36 = vmul.f32 %v3179_v50, %v4462_v52  ;;  %v2427_v53 = vpop.f32.mrb[15].mxu1 }
 0x25b   : > { %v2537_v45 = vmul.f32 %v4462_v52, %v2427_v53 }
 0x25c   : > { %v2577_v54 = vadd.f32 %v4467_v11, %v2538_v36 }
 0x25d   : > { %v2576_v46 = vadd.f32 %v4467_v11, %v2537_v45 }
 0x25e   : > { %v2609_v61 = vmax.f32 %v2577_v54, 0.0 }
 0x25f   : > { %v2608_v60 = vmax.f32 %v2576_v46, 0.0 }
 0x260   : > { %2720 = vrot.lane.b32.xlu1 %v2609_v61, %s3266_s30  ;;  %v2631_v61 = vld [vmem:[%s3551_s12 + $0x28] sm:$0xff] }
 0x261   : > { %2718 = vrot.lane.b32.xlu0 %v2608_v60, %s3266_s30 }
 0x262   : > { %v3182_v4 = vpop.f32.mrb[16].mxu1 }
 0x263   : > { %v2540_v62 = vmul.f32 %v3182_v4, %v4462_v52  ;;  %v2437_v10 = vpop.f32.mrb[17].mxu1  ;;  %v2630_v4 = vld [vmem:[%s3551_s12 + $0x20] sm:$0xff] }
 0x264   : > { %v2539_v39 = vmul.f32 %v4462_v52, %v2437_v10 }
 0x265   : > { %v2579_v30 = vadd.f32 %v4467_v11, %v2540_v62 }
 0x266   : > { %v2578_v7 = vadd.f32 %v4467_v11, %v2539_v39 }
 0x267   : > { %v2611_v48 = vmax.f32 %v2579_v30, 0.0 }
 0x268   : > { %v2610_v24 = vmax.f32 %v2578_v7, 0.0 }
 0x269   : > { %2724 = vrot.lane.b32.xlu1 %v2611_v48, %s3266_s30 }
 0x26a   : > { %2722 = vrot.lane.b32.xlu0 %v2610_v24, %s3266_s30 }
 0x26b   : > { %v3185_v9 = vpop.f32.mrb[18].mxu1 }
 0x26c   : > { %v2542_v47 = vmul.f32 %v3185_v9, %v4462_v52  ;;  %v2447_v44 = vpop.f32.mrb[19].mxu1 }
 0x26d   : > { %v2541_v27 = vmul.f32 %v4462_v52, %v2447_v44 }
 0x26e   : > { %v2581_v40 = vadd.f32 %v4467_v11, %v2542_v47 }
 0x26f   : > { %v2580_v17 = vadd.f32 %v4467_v11, %v2541_v27 }
 0x270   : > { %v2613_v5 = vmax.f32 %v2581_v40, 0.0 }
 0x271   : > { %v2612_v28 = vmax.f32 %v2580_v17, 0.0  ;;  %v2633_v17 = vld [vmem:[%s3551_s12 + $0x38] sm:$0xff] }
 0x272   : > { %2728 = vrot.lane.b32.xlu1 %v2613_v5, %s3266_s30 }
 0x273   : > { %2726 = vrot.lane.b32.xlu0 %v2612_v28, %s3266_s30 }
 0x275   : > { %v3188_v41 = vpop.f32.mrb[20].mxu1 }
 0x276   : > { %v2544_v15 = vmul.f32 %v3188_v41, %v4462_v52  ;;  %v2457_v13 = vpop.f32.mrb[21].mxu1  ;;  %v2632_v41 = vld [vmem:[%s3551_s12 + $0x30] sm:$0xff] }
 0x277   : > { %v2543_v37 = vmul.f32 %v4462_v52, %v2457_v13 }
 0x278   : > { %v2583_v63 = vadd.f32 %v4467_v11, %v2544_v15 }
 0x279   : > { %v2582_v19 = vadd.f32 %v4467_v11, %v2543_v37 }
 0x27a   : > { %v2615_v31 = vmax.f32 %v2583_v63, 0.0 }
 0x27b   : > { %v2614_v58 = vmax.f32 %v2582_v19, 0.0 }
 0x27c   : > { %2732 = vrot.lane.b32.xlu1 %v2615_v31, %s3266_s30 }
 0x27d   : > { %2730 = vrot.lane.b32.xlu0 %v2614_v58, %s3266_s30 }
 0x27e   : > { %v2693_v42 = vpop.permute.xlu0 %2692  ;;  %v3191_v22 = vpop.f32.mrb[22].mxu1 }
 0x27f   : > { %v2787_v6 = vsel %vm737_vm2, %v2627_v59, %v2693_v42  ;;  %v2546_v55 = vmul.f32 %v3191_v22, %v4462_v52  ;;  %v2467_v33 = vpop.f32.mrb[23].mxu1  ;;  %v2635_v42 = vld [vmem:[%s3551_s12 + $0x48] sm:$0xff] }
 0x280   : > { %2819 = vst.msk [vmem:[%s4541_s15 + $0x8] sm:$0xff] %vm680_vm1, %v2787_v6  ;;  %v2545_v25 = vmul.f32 %v4462_v52, %v2467_v33  ;;  %v2634_v6 = vld [vmem:[%s3551_s12 + $0x40] sm:$0xff]  ;;  %v2637_v33 = vld [vmem:[%s3551_s12 + $0x58] sm:$0xff] }
 0x281   : > { %v2585_v16 = vadd.f32 %v4467_v11, %v2546_v55 }
 0x282   : > { %v2691_v35 = vpop.permute.xlu0 %2690  ;;  %v2584_v57 = vadd.f32 %v4467_v11, %v2545_v25  ;;  %v2636_v25 = vld [vmem:[%s3551_s12 + $0x50] sm:$0xff] }
 0x283   : > { %v2786_v26 = vsel %vm737_vm2, %v2626_v1, %v2691_v35  ;;  %v2617_v32 = vmax.f32 %v2585_v16, 0.0 }
 0x284   : > { %2818 = vst.msk [vmem:[%s4541_s15] sm:$0xff] %vm680_vm1, %v2786_v26  ;;  %v2616_v18 = vmax.f32 %v2584_v57, 0.0 }
 0x285   : > { %2736 = vrot.lane.b32.xlu1 %v2617_v32, %s3266_s30  ;;  %v2639_v32 = vld [vmem:[%s3551_s12 + $0x68] sm:$0xff] }
 0x286   : > { %2734 = vrot.lane.b32.xlu0 %v2616_v18, %s3266_s30  ;;  %v2638_v18 = vld [vmem:[%s3551_s12 + $0x60] sm:$0xff] }
 0x288   : > { %v3194_v3 = vpop.f32.mrb[24].mxu1 }
 0x289   : > { %v2548_v8 = vmul.f32 %v3194_v3, %v4462_v52  ;;  %v2477_v43 = vpop.f32.mrb[25].mxu1 }
 0x28a   : > { %v2547_v0 = vmul.f32 %v4462_v52, %v2477_v43 }
 0x28b   : > { %v2587_v51 = vadd.f32 %v4467_v11, %v2548_v8 }
 0x28c   : > { %v2586_v56 = vadd.f32 %v4467_v11, %v2547_v0  ;;  %v2697_v49 = vpop.permute.xlu1 %2696 }
 0x28d   : > { %v2619_v12 = vmax.f32 %v2587_v51, 0.0  ;;  %v2789_v38 = vsel %vm737_vm2, %v2629_v20, %v2697_v49  ;;  %v2641_v51 = vld [vmem:[%s3551_s12 + $0x78] sm:$0xff]  ;;  %v2640_v20 = vld [vmem:[%s3551_s12 + $0x70] sm:$0xff] }
 0x28e   : > { %v2618_v14 = vmax.f32 %v2586_v56, 0.0  ;;  %2821 = vst.msk [vmem:[%s4541_s15 + $0x18] sm:$0xff] %vm680_vm1, %v2789_v38  ;;  %v2643_v38 = vld [vmem:[%s3551_s12 + $0x88] sm:$0xff] }
 0x28f   : > { %2740 = vrot.lane.b32.xlu1 %v2619_v12, %s3266_s30 }
 0x290   : > { %2738 = vrot.lane.b32.xlu0 %v2618_v14, %s3266_s30  ;;  %v2695_v2 = vpop.permute.xlu1 %2694 }
 0x291   : > { %v3197_v34 = vpop.f32.mrb[26].mxu1  ;;  %v2788_v50 = vsel %vm737_vm2, %v2628_v29, %v2695_v2  ;;  %v2642_v29 = vld [vmem:[%s3551_s12 + $0x80] sm:$0xff] }
 0x292   : > { %v2550_v23 = vmul.f32 %v3197_v34, %v4462_v52  ;;  %v2487_v21 = vpop.f32.mrb[27].mxu1  ;;  %2820 = vst.msk [vmem:[%s4541_s15 + $0x10] sm:$0xff] %vm680_vm1, %v2788_v50  ;;  %v2645_v50 = vld [vmem:[%s3551_s12 + $0x98] sm:$0xff] }
 0x293   : > { %v2549_v36 = vmul.f32 %v4462_v52, %v2487_v21 }
 0x294   : > { %v2589_v53 = vadd.f32 %v4467_v11, %v2550_v23 }
 0x295   : > { %v2588_v45 = vadd.f32 %v4467_v11, %v2549_v36  ;;  %v2644_v36 = vld [vmem:[%s3551_s12 + $0x90] sm:$0xff] }
 0x296   : > { %v2621_v54 = vmax.f32 %v2589_v53, 0.0 }
 0x297   : > { %v2620_v46 = vmax.f32 %v2588_v45, 0.0 }
 0x298   : > { %2744 = vrot.lane.b32.xlu1 %v2621_v54, %s3266_s30 }
 0x299   : > { %2742 = vrot.lane.b32.xlu0 %v2620_v46, %s3266_s30 }
 0x29b   : > { %v3200_v60 = vpop.f32.mrb[28].mxu1 }
 0x29c   : > { %v2552_v62 = vmul.f32 %v3200_v60, %v4462_v52  ;;  %v2497_v10 = vpop.f32.mrb[29].mxu1  ;;  %v2701_v39 = vpop.permute.xlu1 %2700  ;;  %v2646_v60 = vld [vmem:[%s3551_s12 + $0xa0] sm:$0xff] }
 0x29d   : > { %v2551_v30 = vmul.f32 %v4462_v52, %v2497_v10  ;;  %v2699_v7 = vpop.permute.xlu0 %2698  ;;  %v2791_v48 = vsel %vm737_vm2, %v2631_v61, %v2701_v39  ;;  %v2647_v61 = vld [vmem:[%s3551_s12 + $0xa8] sm:$0xff] }
 0x29e   : > { %v2591_v24 = vadd.f32 %v4467_v11, %v2552_v62  ;;  %v2790_v9 = vsel %vm737_vm2, %v2630_v4, %v2699_v7  ;;  %2823 = vst.msk [vmem:[%s4541_s15 + $0x28] sm:$0xff] %vm680_vm1, %v2791_v48  ;;  %v2648_v7 = vld [vmem:[%s3551_s12 + $0xb0] sm:$0xff] }
 0x29f   : > { %v2590_v47 = vadd.f32 %v4467_v11, %v2551_v30  ;;  %2822 = vst.msk [vmem:[%s4541_s15 + $0x20] sm:$0xff] %vm680_vm1, %v2790_v9  ;;  %v2649_v30 = vld [vmem:[%s3551_s12 + $0xb8] sm:$0xff] }
 0x2a0   : > { %v2623_v44 = vmax.f32 %v2591_v24, 0.0 }
 0x2a1   : > { %v2622_v27 = vmax.f32 %v2590_v47, 0.0 }
 0x2a2   : > { %2748 = vrot.lane.b32.xlu1 %v2623_v44, %s3266_s30  ;;  %v2651_v44 = vld [vmem:[%s3551_s12 + $0xc8] sm:$0xff] }
 0x2a3   : > { %2746 = vrot.lane.b32.xlu0 %v2622_v27, %s3266_s30  ;;  %v2650_v27 = vld [vmem:[%s3551_s12 + $0xc0] sm:$0xff] }
 0x2a4   : > { %v3203_v40 = vpop.f32.mrb[30].mxu1 }
 0x2a5   : > { %v2554_v5 = vmul.f32 %v3203_v40, %v4462_v52  ;;  %v2507_v28 = vpop.f32.mrb[31].mxu1  ;;  %v2705_v13 = vpop.permute.xlu1 %2704 }
 0x2a6   : > { %v2553_v15 = vmul.f32 %v4462_v52, %v2507_v28  ;;  %v2703_v63 = vpop.permute.xlu0 %2702  ;;  %v2793_v19 = vsel %vm737_vm2, %v2633_v17, %v2705_v13 }
 0x2a7   : > { %v2593_v37 = vadd.f32 %v4467_v11, %v2554_v5  ;;  %v2792_v59 = vsel %vm737_vm2, %v2632_v41, %v2703_v63  ;;  %2825 = vst.msk [vmem:[%s4541_s15 + $0x38] sm:$0xff] %vm680_vm1, %v2793_v19  ;;  %v2653_v41 = vld [vmem:[%s3551_s12 + $0xd8] sm:$0xff] }
 0x2a8   : > { %v2592_v31 = vadd.f32 %v4467_v11, %v2553_v15  ;;  %2824 = vst.msk [vmem:[%s4541_s15 + $0x30] sm:$0xff] %vm680_vm1, %v2792_v59  ;;  %v2652_v15 = vld [vmem:[%s3551_s12 + $0xd0] sm:$0xff]  ;;  %v2654_v59 = vld [vmem:[%s3551_s12 + $0xe0] sm:$0xff] }
 0x2a9   : > { %v2625_v58 = vmax.f32 %v2593_v37, 0.0 }
 0x2aa   : > { %v2624_v52 = vmax.f32 %v2592_v31, 0.0  ;;  %v2655_v31 = vld [vmem:[%s3551_s12 + $0xe8] sm:$0xff] }
 0x2ab   : > { %2752 = vrot.lane.b32.xlu1 %v2625_v58, %s3266_s30 }
 0x2ac   : > { %2750 = vrot.lane.b32.xlu0 %v2624_v52, %s3266_s30 }
 0x2b1   : > { %v2709_v11 = vpop.permute.xlu1 %2708 }
 0x2b2   : > { %v2707_v22 = vpop.permute.xlu0 %2706  ;;  %v2795_v1 = vsel %vm737_vm2, %v2635_v42, %v2709_v11  ;;  %v2657_v11 = vld [vmem:[%s3551_s12 + $0xf8] sm:$0xff] }
 0x2b3   : > { %v2794_v55 = vsel %vm737_vm2, %v2634_v6, %v2707_v22  ;;  %2827 = vst.msk [vmem:[%s4541_s15 + $0x48] sm:$0xff] %vm680_vm1, %v2795_v1  ;;  %v2656_v22 = vld [vmem:[%s3551_s12 + $0xf0] sm:$0xff] }
 0x2b4   : > { %2826 = vst.msk [vmem:[%s4541_s15 + $0x40] sm:$0xff] %vm680_vm1, %v2794_v55 }
 0x2bc   : > { %v2713_v35 = vpop.permute.xlu1 %2712 }
 0x2bd   : > { %v2711_v16 = vpop.permute.xlu0 %2710  ;;  %v2797_v26 = vsel %vm737_vm2, %v2637_v33, %v2713_v35 }
 0x2be   : > { %v2796_v57 = vsel %vm737_vm2, %v2636_v25, %v2711_v16  ;;  %2829 = vst.msk [vmem:[%s4541_s15 + $0x58] sm:$0xff] %vm680_vm1, %v2797_v26 }
 0x2bf   : > { %2828 = vst.msk [vmem:[%s4541_s15 + $0x50] sm:$0xff] %vm680_vm1, %v2796_v57 }
 0x2c7   : > { %v2717_v3 = vpop.permute.xlu1 %2716 }
 0x2c8   : > { %v2715_v8 = vpop.permute.xlu0 %2714  ;;  %v2799_v43 = vsel %vm737_vm2, %v2639_v32, %v2717_v3 }
 0x2c9   : > { %v2798_v0 = vsel %vm737_vm2, %v2638_v18, %v2715_v8  ;;  %2831 = vst.msk [vmem:[%s4541_s15 + $0x68] sm:$0xff] %vm680_vm1, %v2799_v43 }
 0x2ca   : > { %2830 = vst.msk [vmem:[%s4541_s15 + $0x60] sm:$0xff] %vm680_vm1, %v2798_v0 }
 0x2d2   : > { %v2721_v56 = vpop.permute.xlu1 %2720 }
 0x2d3   : > { %v2719_v12 = vpop.permute.xlu0 %2718  ;;  %v2801_v49 = vsel %vm737_vm2, %v2641_v51, %v2721_v56 }
 0x2d4   : > { %v2800_v14 = vsel %vm737_vm2, %v2640_v20, %v2719_v12  ;;  %2833 = vst.msk [vmem:[%s4541_s15 + $0x78] sm:$0xff] %vm680_vm1, %v2801_v49 }
 0x2d5   : > { %2832 = vst.msk [vmem:[%s4541_s15 + $0x70] sm:$0xff] %vm680_vm1, %v2800_v14 }
 0x2db   : > { %v2725_v34 = vpop.permute.xlu1 %2724 }
 0x2dc   : > { %v2723_v2 = vpop.permute.xlu0 %2722  ;;  %v2803_v23 = vsel %vm737_vm2, %v2643_v38, %v2725_v34 }
 0x2dd   : > { %v2802_v21 = vsel %vm737_vm2, %v2642_v29, %v2723_v2  ;;  %2835 = vst.msk [vmem:[%s4541_s15 + $0x88] sm:$0xff] %vm680_vm1, %v2803_v23 }
 0x2de   : > { %2834 = vst.msk [vmem:[%s4541_s15 + $0x80] sm:$0xff] %vm680_vm1, %v2802_v21 }
 0x2e4   : > { %v2729_v53 = vpop.permute.xlu1 %2728 }
 0x2e5   : > { %v2727_v45 = vpop.permute.xlu0 %2726  ;;  %v2805_v54 = vsel %vm737_vm2, %v2645_v50, %v2729_v53 }
 0x2e6   : > { %v2804_v46 = vsel %vm737_vm2, %v2644_v36, %v2727_v45  ;;  %2837 = vst.msk [vmem:[%s4541_s15 + $0x98] sm:$0xff] %vm680_vm1, %v2805_v54 }
 0x2e7   : > { %2836 = vst.msk [vmem:[%s4541_s15 + $0x90] sm:$0xff] %vm680_vm1, %v2804_v46 }
 0x2ee   : > { %v2733_v4 = vpop.permute.xlu1 %2732 }
 0x2ef   : > { %v2731_v62 = vpop.permute.xlu0 %2730  ;;  %v2807_v10 = vsel %vm737_vm2, %v2647_v61, %v2733_v4 }
 0x2f0   : > { %v2806_v39 = vsel %vm737_vm2, %v2646_v60, %v2731_v62  ;;  %2839 = vst.msk [vmem:[%s4541_s15 + $0xa8] sm:$0xff] %vm680_vm1, %v2807_v10 }
 0x2f1   : > { %2838 = vst.msk [vmem:[%s4541_s15 + $0xa0] sm:$0xff] %vm680_vm1, %v2806_v39 }
 0x2f7   : > { %v2737_v48 = vpop.permute.xlu1 %2736 }
 0x2f8   : > { %v2735_v24 = vpop.permute.xlu0 %2734  ;;  %v2809_v9 = vsel %vm737_vm2, %v2649_v30, %v2737_v48 }
 0x2f9   : > { %v2808_v47 = vsel %vm737_vm2, %v2648_v7, %v2735_v24  ;;  %2841 = vst.msk [vmem:[%s4541_s15 + $0xb8] sm:$0xff] %vm680_vm1, %v2809_v9 }
 0x2fa   : > { %2840 = vst.msk [vmem:[%s4541_s15 + $0xb0] sm:$0xff] %vm680_vm1, %v2808_v47 }
 0x301   : > { %v2741_v40 = vpop.permute.xlu1 %2740 }
 0x302   : > { %v2739_v17 = vpop.permute.xlu0 %2738  ;;  %v2811_v5 = vsel %vm737_vm2, %v2651_v44, %v2741_v40 }
 0x303   : > { %v2810_v28 = vsel %vm737_vm2, %v2650_v27, %v2739_v17  ;;  %2843 = vst.msk [vmem:[%s4541_s15 + $0xc8] sm:$0xff] %vm680_vm1, %v2811_v5 }
 0x304   : > { %2842 = vst.msk [vmem:[%s4541_s15 + $0xc0] sm:$0xff] %vm680_vm1, %v2810_v28 }
 0x30a   : > { %v2745_v13 = vpop.permute.xlu1 %2744 }
 0x30b   : > { %v2743_v37 = vpop.permute.xlu0 %2742  ;;  %v2813_v63 = vsel %vm737_vm2, %v2653_v41, %v2745_v13 }
 0x30c   : > { %v2812_v19 = vsel %vm737_vm2, %v2652_v15, %v2743_v37  ;;  %2845 = vst.msk [vmem:[%s4541_s15 + $0xd8] sm:$0xff] %vm680_vm1, %v2813_v63 }
 0x30d   : > { %2844 = vst.msk [vmem:[%s4541_s15 + $0xd0] sm:$0xff] %vm680_vm1, %v2812_v19 }
 0x314   : > { %v2749_v58 = vpop.permute.xlu1 %2748 }
 0x315   : > { %v2747_v52 = vpop.permute.xlu0 %2746  ;;  %v2815_v42 = vsel %vm737_vm2, %v2655_v31, %v2749_v58 }
 0x316   : > { %v2814_v6 = vsel %vm737_vm2, %v2654_v59, %v2747_v52  ;;  %2847 = vst.msk [vmem:[%s4541_s15 + $0xe8] sm:$0xff] %vm680_vm1, %v2815_v42 }
 0x317   : > { %2846 = vst.msk [vmem:[%s4541_s15 + $0xe0] sm:$0xff] %vm680_vm1, %v2814_v6 }
 0x31d   : > { %v2753_v1 = vpop.permute.xlu1 %2752 }
 0x31e   : > { %v2751_v55 = vpop.permute.xlu0 %2750  ;;  %v2817_v33 = vsel %vm737_vm2, %v2657_v11, %v2753_v1 }
 0x31f   : > { %v2816_v25 = vsel %vm737_vm2, %v2656_v22, %v2751_v55  ;;  %2849 = vst.msk [vmem:[%s4541_s15 + $0xf8] sm:$0xff] %vm680_vm1, %v2817_v33 }
 0x320   : > { %2848 = vst.msk [vmem:[%s4541_s15 + $0xf0] sm:$0xff] %vm680_vm1, %v2816_v25 }
 0x321 PF: > { %p17_p9 = scmp.ge.s32.totalorder %s3339_s17, 4   ;;  %s4723_s13 = smov %s3259_s14 }
 0x322   : > { %s4724_s14 = smov %s3348_s20  ;;  %s4725_s15 = smov %s3339_s17 }
 0x323   :  { %19 = sbr.rel (!%p17_p9) target bundleno = 2 (0x2), region = 136 }

</bundles_post_ra>
